<compile_context>
chip_gen: v5e
topology: v5e:2x2
jax: 0.10.0
libtpu: 0.0.40
codegen_flags: <defaults>
</compile_context>

<pallas_src>
import functools
import math

import numpy as np
import jax
import jax.numpy as jnp
from jax.experimental import pallas as pl
from jax.experimental.pallas import tpu as pltpu


# ----------------------------------------------------------------------------
# Fused Pallas kernel: 1x1 conv -> self-attention -> flatten(C-major) -> fc1
# (single invocation, whole batch resident in VMEM)
# ----------------------------------------------------------------------------
def joiner_kernel(x_ref, convw_ref, convb_ref, pos_ref, fcw_ref, fcb_ref,
                  out_ref, flat_ref, *, scale):
    # Block shapes (all full-array blocks):
    #   x_ref   (B, Cin, S)   NCHW channel planes (free reshape of (B,3,H,W))
    #   convw   (C, Cin)      Conv2d weight in PyTorch (Cout, Cin) layout
    #   convb   (C, 1)
    #   pos     (C, S)        batch-invariant sine positional encoding
    #   fcw     (C*S, NC)     fc1 weight, (in, out) layout, un-padded
    #   fcb     (1, NC)
    #   out     (B, NC)
    #   flat    (B, C*S)      VMEM scratch: activations in flatten(1) order
    x = x_ref[...]                      # (B, Cin, S)
    w = convw_ref[...]                  # (C, Cin)
    b = convb_ref[...]                  # (C, 1)
    pos = pos_ref[...]                  # (C, S)
    B, Cin, S = x.shape
    C = w.shape[0]

    for bi in range(B):                 # B == 2, static unroll
        xb = x[bi]                      # (Cin, S)

        # --- backbone: 1x1 conv as Cin broadcast-FMAs on the VPU (K=3 would
        # waste the MXU); result h is channel-major (C, S).
        h = b
        for k in range(Cin):            # Cin == 3, static unroll
            h = h + w[:, k:k + 1] * xb[k:k + 1, :]      # (C,1)*(1,S) -> (C,S)

        # --- encoder: single-head self-attention; key mask (create_mask) is
        # all False so no masking is applied.  q == k == src + pos, v == src.
        src = 0.4 * h                   # matches `src = 0.4 * h` in forward
        q = src + pos
        v = src

        # scores[i,j] = scale * sum_c q[c,i] q[c,j]
        # transposed-LHS matmul: no explicit q.T relayout through the XLU.
        s = jax.lax.dot_general(q, q, (((0,), (0,)), ((), ())),
                                preferred_element_type=jnp.float32) * scale
        s = s - jnp.max(s, axis=-1, keepdims=True)
        p = jnp.exp(s)
        p = p / jnp.sum(p, axis=-1, keepdims=True)       # exact softmax

        # att[c,i] = sum_j v[c,j] p[i,j]  (NT matmul, no transpose)
        att = jax.lax.dot_general(v, p, (((1,), (1,)), ((), ())),
                                  preferred_element_type=jnp.float32)  # (C,S)

        # --- bypass == False: flatten att in PyTorch (C,H,W) order into the
        # shared (B, C*S) scratch.  Channels are written in pairs so every
        # store is a lane-aligned, unmasked 128-lane store (S == 64).
        if C % 2 == 0:
            for c in range(0, C, 2):
                pair = jnp.concatenate(
                    [att[c:c + 1, :], att[c + 1:c + 2, :]], axis=1)  # (1, 2S)
                flat_ref[bi:bi + 1, c * S:(c + 2) * S] = pair
        else:
            for c in range(C):
                flat_ref[bi:bi + 1, c * S:(c + 1) * S] = att[c:c + 1, :]

    # --- fc1: one batched (B, C*S) x (C*S, NC) matmul for the whole batch
    # (weight pushed through the MXU once, not once per batch element).
    out_ref[...] = (jnp.dot(flat_ref[...], fcw_ref[...],
                            preferred_element_type=jnp.float32)
                    + fcb_ref[...]).astype(out_ref.dtype)


# ----------------------------------------------------------------------------
# Wrapper: one pallas_call, single grid step, whole forward fused.
# ----------------------------------------------------------------------------
@functools.partial(jax.jit, static_argnames=("num_classes",))
def joiner_forward(x_nchw, conv_w, conv_b, fc_w, fc_b, pos_chw, *, num_classes=10):
    B, Cin, H, W = x_nchw.shape
    C = conv_w.shape[0]
    S = H * W

    # Metadata-only reshapes (keep NCHW, merge H,W -> S): no data movement.
    x3 = x_nchw.reshape(B, Cin, S)
    pos2 = pos_chw.reshape(C, S)                 # batch-invariant
    convb_col = conv_b.reshape(C, 1)
    fcb_row = fc_b.reshape(1, num_classes)

    kernel = functools.partial(joiner_kernel, scale=1.0 / math.sqrt(C))
    logits = pl.pallas_call(
        kernel,
        out_shape=jax.ShapeDtypeStruct((B, num_classes), jnp.float32),
        grid=(1,),
        in_specs=[
            pl.BlockSpec((B, Cin, S), lambda i: (0, 0, 0)),
            pl.BlockSpec((C, Cin), lambda i: (0, 0)),
            pl.BlockSpec((C, 1), lambda i: (0, 0)),
            pl.BlockSpec((C, S), lambda i: (0, 0)),
            pl.BlockSpec((C * S, num_classes), lambda i: (0, 0)),
            pl.BlockSpec((1, num_classes), lambda i: (0, 0)),
        ],
        out_specs=pl.BlockSpec((B, num_classes), lambda i: (0, 0)),
        scratch_shapes=[pltpu.VMEM((B, C * S), jnp.float32)],
    )(x3, conv_w, convb_col, pos2, fc_w, fcb_row)
    return logits


# ----------------------------------------------------------------------------
# Parameter / buffer construction (deterministic, in-script)
# ----------------------------------------------------------------------------
def positionalencoding2d(d_model, height, width):
    # PositionalEncodingSin.positionalencoding2d, batch-invariant (C, H, W).
    pe = np.zeros((d_model, height, width), dtype=np.float32)
    dm = d_model // 2
    div_term = np.exp(
        np.arange(0, dm, 2, dtype=np.float32) * -(math.log(10000.0) / dm))
    pos_w = np.arange(width, dtype=np.float32)[:, None]
    pos_h = np.arange(height, dtype=np.float32)[:, None]
    pe[0:dm:2, :, :] = np.repeat(np.sin(pos_w * div_term).T[:, None, :], height, axis=1)
    pe[1:dm:2, :, :] = np.repeat(np.cos(pos_w * div_term).T[:, None, :], height, axis=1)
    pe[dm::2, :, :] = np.repeat(np.sin(pos_h * div_term).T[:, :, None], width, axis=2)
    pe[dm + 1::2, :, :] = np.repeat(np.cos(pos_h * div_term).T[:, :, None], width, axis=2)
    return jnp.asarray(pe)


# ----------------------------------------------------------------------------
if __name__ == "__main__":
    B, Cin, H, W = 2, 3, 8, 8           # image_h = image_w = 8 (no downsample)
    hidden_dim = 32
    num_classes = 10
    S = H * W

    key = jax.random.PRNGKey(0)
    k_x, k_cw, k_cb, k_fw, k_fb = jax.random.split(key, 5)

    x = jax.random.normal(k_x, (B, Cin, H, W), jnp.float32)

    # backbone Conv2d(3, hidden_dim, 1): weight (Cout, Cin), bias (Cout,)
    conv_w = jax.random.normal(k_cw, (hidden_dim, Cin), jnp.float32) * 0.1
    conv_b = jax.random.normal(k_cb, (hidden_dim,), jnp.float32) * 0.1

    # fc1: Linear(hidden_dim * H * W, num_classes), stored as (in, out) -- no pad
    fc_w = jax.random.normal(k_fw, (hidden_dim * S, num_classes), jnp.float32) * 0.02
    fc_b = jax.random.normal(k_fb, (num_classes,), jnp.float32) * 0.02

    pos = positionalencoding2d(hidden_dim, H, W)        # (C, H, W), frozen

    out = joiner_forward(x, conv_w, conv_b, fc_w, fc_b, pos,
                         num_classes=num_classes)
    out = jax.block_until_ready(out)
    assert out.shape == (B, num_classes), out.shape
    print("KERNEL_OK")
</pallas_src>

<mosaic_0001>
module attributes {stable_mosaic.version = 11 : i64} {
  func.func @joiner_kernel(%arg0: i32, %arg1: memref<2x3x64xf32, #tpu.memory_space<vmem>>, %arg2: memref<32x3xf32, #tpu.memory_space<vmem>>, %arg3: memref<32x1xf32, #tpu.memory_space<vmem>>, %arg4: memref<32x64xf32, #tpu.memory_space<vmem>>, %arg5: memref<2048x10xf32, #tpu.memory_space<vmem>>, %arg6: memref<1x10xf32, #tpu.memory_space<vmem>>, %arg7: memref<2x10xf32, #tpu.memory_space<vmem>>, %arg8: memref<2x2048xf32, #tpu.memory_space<vmem>>) attributes {dimension_semantics = [#tpu.dimension_semantics<arbitrary>], iteration_bounds = array<i64: 1>, scalar_prefetch = 0 : i64, scratch_operands = 1 : i64, tpu.core_type = #tpu.core_type<tc>, window_params = [{pipeline_mode = #tpu.pipeline_mode<synchronous>, transform_indices = @transform_0, window_bounds = array<i64: 2, 3, 64>}, {pipeline_mode = #tpu.pipeline_mode<synchronous>, transform_indices = @transform_1, window_bounds = array<i64: 32, 3>}, {pipeline_mode = #tpu.pipeline_mode<synchronous>, transform_indices = @transform_2, window_bounds = array<i64: 32, 1>}, {pipeline_mode = #tpu.pipeline_mode<synchronous>, transform_indices = @transform_3, window_bounds = array<i64: 32, 64>}, {pipeline_mode = #tpu.pipeline_mode<synchronous>, transform_indices = @transform_4, window_bounds = array<i64: 2048, 10>}, {pipeline_mode = #tpu.pipeline_mode<synchronous>, transform_indices = @transform_5, window_bounds = array<i64: 1, 10>}, {pipeline_mode = #tpu.pipeline_mode<synchronous>, transform_indices = @transform_6, window_bounds = array<i64: 2, 10>}]} {
    %c0 = arith.constant 0 : index
    %c0_0 = arith.constant 0 : index
    %c0_1 = arith.constant 0 : index
    %0 = vector.load %arg1[%c0, %c0_0, %c0_1] : memref<2x3x64xf32, #tpu.memory_space<vmem>>, vector<2x3x64xf32>
    %c0_2 = arith.constant 0 : index
    %c0_3 = arith.constant 0 : index
    %1 = vector.load %arg2[%c0_2, %c0_3] : memref<32x3xf32, #tpu.memory_space<vmem>>, vector<32x3xf32>
    %c0_4 = arith.constant 0 : index
    %c0_5 = arith.constant 0 : index
    %2 = vector.load %arg3[%c0_4, %c0_5] : memref<32x1xf32, #tpu.memory_space<vmem>>, vector<32x1xf32>
    %c0_6 = arith.constant 0 : index
    %c0_7 = arith.constant 0 : index
    %3 = vector.load %arg4[%c0_6, %c0_7] : memref<32x64xf32, #tpu.memory_space<vmem>>, vector<32x64xf32>
    %4 = vector.extract_strided_slice %0 {offsets = [0, 0, 0], sizes = [1, 3, 64], strides = [1, 1, 1]} : vector<2x3x64xf32> to vector<1x3x64xf32>
    %5 = vector.shape_cast %4 : vector<1x3x64xf32> to vector<3x64xf32>
    %6 = vector.extract_strided_slice %1 {offsets = [0, 0], sizes = [32, 1], strides = [1, 1]} : vector<32x3xf32> to vector<32x1xf32>
    %7 = vector.extract_strided_slice %5 {offsets = [0, 0], sizes = [1, 64], strides = [1, 1]} : vector<3x64xf32> to vector<1x64xf32>
    %8 = vector.broadcast %6 : vector<32x1xf32> to vector<32x64xf32>
    %9 = vector.broadcast %7 : vector<1x64xf32> to vector<32x64xf32>
    %10 = arith.mulf %8, %9 : vector<32x64xf32>
    %11 = vector.broadcast %2 : vector<32x1xf32> to vector<32x64xf32>
    %12 = arith.addf %11, %10 : vector<32x64xf32>
    %13 = vector.extract_strided_slice %1 {offsets = [0, 1], sizes = [32, 1], strides = [1, 1]} : vector<32x3xf32> to vector<32x1xf32>
    %14 = vector.extract_strided_slice %5 {offsets = [1, 0], sizes = [1, 64], strides = [1, 1]} : vector<3x64xf32> to vector<1x64xf32>
    %15 = vector.broadcast %13 : vector<32x1xf32> to vector<32x64xf32>
    %16 = vector.broadcast %14 : vector<1x64xf32> to vector<32x64xf32>
    %17 = arith.mulf %15, %16 : vector<32x64xf32>
    %18 = arith.addf %12, %17 : vector<32x64xf32>
    %19 = vector.extract_strided_slice %1 {offsets = [0, 2], sizes = [32, 1], strides = [1, 1]} : vector<32x3xf32> to vector<32x1xf32>
    %20 = vector.extract_strided_slice %5 {offsets = [2, 0], sizes = [1, 64], strides = [1, 1]} : vector<3x64xf32> to vector<1x64xf32>
    %21 = vector.broadcast %19 : vector<32x1xf32> to vector<32x64xf32>
    %22 = vector.broadcast %20 : vector<1x64xf32> to vector<32x64xf32>
    %23 = arith.mulf %21, %22 : vector<32x64xf32>
    %24 = arith.addf %18, %23 : vector<32x64xf32>
    %cst = arith.constant 4.000000e-01 : f32
    %25 = vector.broadcast %cst : f32 to vector<32x64xf32>
    %26 = arith.mulf %25, %24 : vector<32x64xf32>
    %27 = arith.addf %26, %3 : vector<32x64xf32>
    %cst_8 = arith.constant dense<0.000000e+00> : vector<64x64xf32>
    %28 = tpu.matmul %27, %27, %cst_8 {dimension_numbers = #tpu.dot_dimension_numbers<[0], [0], [1], [1], [0, 1, 1, 1], [], []>} : vector<32x64xf32>, vector<32x64xf32>, vector<64x64xf32> -> vector<64x64xf32>
    %cst_9 = arith.constant 0.176776692 : f32
    %29 = vector.broadcast %cst_9 : f32 to vector<64x64xf32>
    %30 = arith.mulf %28, %29 : vector<64x64xf32>
    %cst_10 = arith.constant dense<0xFF800000> : vector<64xf32>
    %31 = vector.multi_reduction <maximumf>, %30, %cst_10 [1] : vector<64x64xf32> to vector<64xf32>
    %32 = vector.shape_cast %31 : vector<64xf32> to vector<64x1xf32>
    %33 = vector.broadcast %32 : vector<64x1xf32> to vector<64x64xf32>
    %34 = arith.subf %30, %33 : vector<64x64xf32>
    %35 = math.exp %34 : vector<64x64xf32>
    %cst_11 = arith.constant dense<0.000000e+00> : vector<64xf32>
    %36 = vector.multi_reduction <add>, %35, %cst_11 [1] : vector<64x64xf32> to vector<64xf32>
    %37 = vector.shape_cast %36 : vector<64xf32> to vector<64x1xf32>
    %38 = vector.broadcast %37 : vector<64x1xf32> to vector<64x64xf32>
    %39 = arith.divf %35, %38 : vector<64x64xf32>
    %cst_12 = arith.constant dense<0.000000e+00> : vector<32x64xf32>
    %40 = tpu.matmul %26, %39, %cst_12 {dimension_numbers = #tpu.dot_dimension_numbers<[1], [1], [0], [0], [0, 0, 1, 0], [], []>} : vector<32x64xf32>, vector<64x64xf32>, vector<32x64xf32> -> vector<32x64xf32>
    %41 = vector.extract_strided_slice %40 {offsets = [0, 0], sizes = [1, 64], strides = [1, 1]} : vector<32x64xf32> to vector<1x64xf32>
    %42 = vector.extract_strided_slice %40 {offsets = [1, 0], sizes = [1, 64], strides = [1, 1]} : vector<32x64xf32> to vector<1x64xf32>
    %43 = tpu.concatenate %41, %42 in 1 : vector<1x64xf32>, vector<1x64xf32> -> vector<1x128xf32>
    %c0_13 = arith.constant 0 : index
    %c0_14 = arith.constant 0 : index
    %44 = vector.load %arg8[%c0_13, %c0_14] : memref<2x2048xf32, #tpu.memory_space<vmem>>, vector<1x128xf32>
    tpu.vector_store %arg8[%c0_13, %c0_14], %43 {strides = array<i32>} : memref<2x2048xf32, #tpu.memory_space<vmem>>, vector<1x128xf32>,
    %45 = vector.extract_strided_slice %40 {offsets = [2, 0], sizes = [1, 64], strides = [1, 1]} : vector<32x64xf32> to vector<1x64xf32>
    %46 = vector.extract_strided_slice %40 {offsets = [3, 0], sizes = [1, 64], strides = [1, 1]} : vector<32x64xf32> to vector<1x64xf32>
    %47 = tpu.concatenate %45, %46 in 1 : vector<1x64xf32>, vector<1x64xf32> -> vector<1x128xf32>
    %c0_15 = arith.constant 0 : index
    %c128 = arith.constant 128 : index
    %48 = vector.load %arg8[%c0_15, %c128] : memref<2x2048xf32, #tpu.memory_space<vmem>>, vector<1x128xf32>
    tpu.vector_store %arg8[%c0_15, %c128], %47 {strides = array<i32>} : memref<2x2048xf32, #tpu.memory_space<vmem>>, vector<1x128xf32>,
    %49 = vector.extract_strided_slice %40 {offsets = [4, 0], sizes = [1, 64], strides = [1, 1]} : vector<32x64xf32> to vector<1x64xf32>
    %50 = vector.extract_strided_slice %40 {offsets = [5, 0], sizes = [1, 64], strides = [1, 1]} : vector<32x64xf32> to vector<1x64xf32>
    %51 = tpu.concatenate %49, %50 in 1 : vector<1x64xf32>, vector<1x64xf32> -> vector<1x128xf32>
    %c0_16 = arith.constant 0 : index
    %c256 = arith.constant 256 : index
    %52 = vector.load %arg8[%c0_16, %c256] : memref<2x2048xf32, #tpu.memory_space<vmem>>, vector<1x128xf32>
    tpu.vector_store %arg8[%c0_16, %c256], %51 {strides = array<i32>} : memref<2x2048xf32, #tpu.memory_space<vmem>>, vector<1x128xf32>,
    %53 = vector.extract_strided_slice %40 {offsets = [6, 0], sizes = [1, 64], strides = [1, 1]} : vector<32x64xf32> to vector<1x64xf32>
    %54 = vector.extract_strided_slice %40 {offsets = [7, 0], sizes = [1, 64], strides = [1, 1]} : vector<32x64xf32> to vector<1x64xf32>
    %55 = tpu.concatenate %53, %54 in 1 : vector<1x64xf32>, vector<1x64xf32> -> vector<1x128xf32>
    %c0_17 = arith.constant 0 : index
    %c384 = arith.constant 384 : index
    %56 = vector.load %arg8[%c0_17, %c384] : memref<2x2048xf32, #tpu.memory_space<vmem>>, vector<1x128xf32>
    tpu.vector_store %arg8[%c0_17, %c384], %55 {strides = array<i32>} : memref<2x2048xf32, #tpu.memory_space<vmem>>, vector<1x128xf32>,
    %57 = vector.extract_strided_slice %40 {offsets = [8, 0], sizes = [1, 64], strides = [1, 1]} : vector<32x64xf32> to vector<1x64xf32>
    %58 = vector.extract_strided_slice %40 {offsets = [9, 0], sizes = [1, 64], strides = [1, 1]} : vector<32x64xf32> to vector<1x64xf32>
    %59 = tpu.concatenate %57, %58 in 1 : vector<1x64xf32>, vector<1x64xf32> -> vector<1x128xf32>
    %c0_18 = arith.constant 0 : index
    %c512 = arith.constant 512 : index
    %60 = vector.load %arg8[%c0_18, %c512] : memref<2x2048xf32, #tpu.memory_space<vmem>>, vector<1x128xf32>
    tpu.vector_store %arg8[%c0_18, %c512], %59 {strides = array<i32>} : memref<2x2048xf32, #tpu.memory_space<vmem>>, vector<1x128xf32>,
    %61 = vector.extract_strided_slice %40 {offsets = [10, 0], sizes = [1, 64], strides = [1, 1]} : vector<32x64xf32> to vector<1x64xf32>
    %62 = vector.extract_strided_slice %40 {offsets = [11, 0], sizes = [1, 64], strides = [1, 1]} : vector<32x64xf32> to vector<1x64xf32>
    %63 = tpu.concatenate %61, %62 in 1 : vector<1x64xf32>, vector<1x64xf32> -> vector<1x128xf32>
    %c0_19 = arith.constant 0 : index
    %c640 = arith.constant 640 : index
    %64 = vector.load %arg8[%c0_19, %c640] : memref<2x2048xf32, #tpu.memory_space<vmem>>, vector<1x128xf32>
    tpu.vector_store %arg8[%c0_19, %c640], %63 {strides = array<i32>} : memref<2x2048xf32, #tpu.memory_space<vmem>>, vector<1x128xf32>,
    %65 = vector.extract_strided_slice %40 {offsets = [12, 0], sizes = [1, 64], strides = [1, 1]} : vector<32x64xf32> to vector<1x64xf32>
    %66 = vector.extract_strided_slice %40 {offsets = [13, 0], sizes = [1, 64], strides = [1, 1]} : vector<32x64xf32> to vector<1x64xf32>
    %67 = tpu.concatenate %65, %66 in 1 : vector<1x64xf32>, vector<1x64xf32> -> vector<1x128xf32>
    %c0_20 = arith.constant 0 : index
    %c768 = arith.constant 768 : index
    %68 = vector.load %arg8[%c0_20, %c768] : memref<2x2048xf32, #tpu.memory_space<vmem>>, vector<1x128xf32>
    tpu.vector_store %arg8[%c0_20, %c768], %67 {strides = array<i32>} : memref<2x2048xf32, #tpu.memory_space<vmem>>, vector<1x128xf32>,
    %69 = vector.extract_strided_slice %40 {offsets = [14, 0], sizes = [1, 64], strides = [1, 1]} : vector<32x64xf32> to vector<1x64xf32>
    %70 = vector.extract_strided_slice %40 {offsets = [15, 0], sizes = [1, 64], strides = [1, 1]} : vector<32x64xf32> to vector<1x64xf32>
    %71 = tpu.concatenate %69, %70 in 1 : vector<1x64xf32>, vector<1x64xf32> -> vector<1x128xf32>
    %c0_21 = arith.constant 0 : index
    %c896 = arith.constant 896 : index
    %72 = vector.load %arg8[%c0_21, %c896] : memref<2x2048xf32, #tpu.memory_space<vmem>>, vector<1x128xf32>
    tpu.vector_store %arg8[%c0_21, %c896], %71 {strides = array<i32>} : memref<2x2048xf32, #tpu.memory_space<vmem>>, vector<1x128xf32>,
    %73 = vector.extract_strided_slice %40 {offsets = [16, 0], sizes = [1, 64], strides = [1, 1]} : vector<32x64xf32> to vector<1x64xf32>
    %74 = vector.extract_strided_slice %40 {offsets = [17, 0], sizes = [1, 64], strides = [1, 1]} : vector<32x64xf32> to vector<1x64xf32>
    %75 = tpu.concatenate %73, %74 in 1 : vector<1x64xf32>, vector<1x64xf32> -> vector<1x128xf32>
    %c0_22 = arith.constant 0 : index
    %c1024 = arith.constant 1024 : index
    %76 = vector.load %arg8[%c0_22, %c1024] : memref<2x2048xf32, #tpu.memory_space<vmem>>, vector<1x128xf32>
    tpu.vector_store %arg8[%c0_22, %c1024], %75 {strides = array<i32>} : memref<2x2048xf32, #tpu.memory_space<vmem>>, vector<1x128xf32>,
    %77 = vector.extract_strided_slice %40 {offsets = [18, 0], sizes = [1, 64], strides = [1, 1]} : vector<32x64xf32> to vector<1x64xf32>
    %78 = vector.extract_strided_slice %40 {offsets = [19, 0], sizes = [1, 64], strides = [1, 1]} : vector<32x64xf32> to vector<1x64xf32>
    %79 = tpu.concatenate %77, %78 in 1 : vector<1x64xf32>, vector<1x64xf32> -> vector<1x128xf32>
    %c0_23 = arith.constant 0 : index
    %c1152 = arith.constant 1152 : index
    %80 = vector.load %arg8[%c0_23, %c1152] : memref<2x2048xf32, #tpu.memory_space<vmem>>, vector<1x128xf32>
    tpu.vector_store %arg8[%c0_23, %c1152], %79 {strides = array<i32>} : memref<2x2048xf32, #tpu.memory_space<vmem>>, vector<1x128xf32>,
    %81 = vector.extract_strided_slice %40 {offsets = [20, 0], sizes = [1, 64], strides = [1, 1]} : vector<32x64xf32> to vector<1x64xf32>
    %82 = vector.extract_strided_slice %40 {offsets = [21, 0], sizes = [1, 64], strides = [1, 1]} : vector<32x64xf32> to vector<1x64xf32>
    %83 = tpu.concatenate %81, %82 in 1 : vector<1x64xf32>, vector<1x64xf32> -> vector<1x128xf32>
    %c0_24 = arith.constant 0 : index
    %c1280 = arith.constant 1280 : index
    %84 = vector.load %arg8[%c0_24, %c1280] : memref<2x2048xf32, #tpu.memory_space<vmem>>, vector<1x128xf32>
    tpu.vector_store %arg8[%c0_24, %c1280], %83 {strides = array<i32>} : memref<2x2048xf32, #tpu.memory_space<vmem>>, vector<1x128xf32>,
    %85 = vector.extract_strided_slice %40 {offsets = [22, 0], sizes = [1, 64], strides = [1, 1]} : vector<32x64xf32> to vector<1x64xf32>
    %86 = vector.extract_strided_slice %40 {offsets = [23, 0], sizes = [1, 64], strides = [1, 1]} : vector<32x64xf32> to vector<1x64xf32>
    %87 = tpu.concatenate %85, %86 in 1 : vector<1x64xf32>, vector<1x64xf32> -> vector<1x128xf32>
    %c0_25 = arith.constant 0 : index
    %c1408 = arith.constant 1408 : index
    %88 = vector.load %arg8[%c0_25, %c1408] : memref<2x2048xf32, #tpu.memory_space<vmem>>, vector<1x128xf32>
    tpu.vector_store %arg8[%c0_25, %c1408], %87 {strides = array<i32>} : memref<2x2048xf32, #tpu.memory_space<vmem>>, vector<1x128xf32>,
    %89 = vector.extract_strided_slice %40 {offsets = [24, 0], sizes = [1, 64], strides = [1, 1]} : vector<32x64xf32> to vector<1x64xf32>
    %90 = vector.extract_strided_slice %40 {offsets = [25, 0], sizes = [1, 64], strides = [1, 1]} : vector<32x64xf32> to vector<1x64xf32>
    %91 = tpu.concatenate %89, %90 in 1 : vector<1x64xf32>, vector<1x64xf32> -> vector<1x128xf32>
    %c0_26 = arith.constant 0 : index
    %c1536 = arith.constant 1536 : index
    %92 = vector.load %arg8[%c0_26, %c1536] : memref<2x2048xf32, #tpu.memory_space<vmem>>, vector<1x128xf32>
    tpu.vector_store %arg8[%c0_26, %c1536], %91 {strides = array<i32>} : memref<2x2048xf32, #tpu.memory_space<vmem>>, vector<1x128xf32>,
    %93 = vector.extract_strided_slice %40 {offsets = [26, 0], sizes = [1, 64], strides = [1, 1]} : vector<32x64xf32> to vector<1x64xf32>
    %94 = vector.extract_strided_slice %40 {offsets = [27, 0], sizes = [1, 64], strides = [1, 1]} : vector<32x64xf32> to vector<1x64xf32>
    %95 = tpu.concatenate %93, %94 in 1 : vector<1x64xf32>, vector<1x64xf32> -> vector<1x128xf32>
    %c0_27 = arith.constant 0 : index
    %c1664 = arith.constant 1664 : index
    %96 = vector.load %arg8[%c0_27, %c1664] : memref<2x2048xf32, #tpu.memory_space<vmem>>, vector<1x128xf32>
    tpu.vector_store %arg8[%c0_27, %c1664], %95 {strides = array<i32>} : memref<2x2048xf32, #tpu.memory_space<vmem>>, vector<1x128xf32>,
    %97 = vector.extract_strided_slice %40 {offsets = [28, 0], sizes = [1, 64], strides = [1, 1]} : vector<32x64xf32> to vector<1x64xf32>
    %98 = vector.extract_strided_slice %40 {offsets = [29, 0], sizes = [1, 64], strides = [1, 1]} : vector<32x64xf32> to vector<1x64xf32>
    %99 = tpu.concatenate %97, %98 in 1 : vector<1x64xf32>, vector<1x64xf32> -> vector<1x128xf32>
    %c0_28 = arith.constant 0 : index
    %c1792 = arith.constant 1792 : index
    %100 = vector.load %arg8[%c0_28, %c1792] : memref<2x2048xf32, #tpu.memory_space<vmem>>, vector<1x128xf32>
    tpu.vector_store %arg8[%c0_28, %c1792], %99 {strides = array<i32>} : memref<2x2048xf32, #tpu.memory_space<vmem>>, vector<1x128xf32>,
    %101 = vector.extract_strided_slice %40 {offsets = [30, 0], sizes = [1, 64], strides = [1, 1]} : vector<32x64xf32> to vector<1x64xf32>
    %102 = vector.extract_strided_slice %40 {offsets = [31, 0], sizes = [1, 64], strides = [1, 1]} : vector<32x64xf32> to vector<1x64xf32>
    %103 = tpu.concatenate %101, %102 in 1 : vector<1x64xf32>, vector<1x64xf32> -> vector<1x128xf32>
    %c0_29 = arith.constant 0 : index
    %c1920 = arith.constant 1920 : index
    %104 = vector.load %arg8[%c0_29, %c1920] : memref<2x2048xf32, #tpu.memory_space<vmem>>, vector<1x128xf32>
    tpu.vector_store %arg8[%c0_29, %c1920], %103 {strides = array<i32>} : memref<2x2048xf32, #tpu.memory_space<vmem>>, vector<1x128xf32>,
    %105 = vector.extract_strided_slice %0 {offsets = [1, 0, 0], sizes = [1, 3, 64], strides = [1, 1, 1]} : vector<2x3x64xf32> to vector<1x3x64xf32>
    %106 = vector.shape_cast %105 : vector<1x3x64xf32> to vector<3x64xf32>
    %107 = vector.extract_strided_slice %1 {offsets = [0, 0], sizes = [32, 1], strides = [1, 1]} : vector<32x3xf32> to vector<32x1xf32>
    %108 = vector.extract_strided_slice %106 {offsets = [0, 0], sizes = [1, 64], strides = [1, 1]} : vector<3x64xf32> to vector<1x64xf32>
    %109 = vector.broadcast %107 : vector<32x1xf32> to vector<32x64xf32>
    %110 = vector.broadcast %108 : vector<1x64xf32> to vector<32x64xf32>
    %111 = arith.mulf %109, %110 : vector<32x64xf32>
    %112 = vector.broadcast %2 : vector<32x1xf32> to vector<32x64xf32>
    %113 = arith.addf %112, %111 : vector<32x64xf32>
    %114 = vector.extract_strided_slice %1 {offsets = [0, 1], sizes = [32, 1], strides = [1, 1]} : vector<32x3xf32> to vector<32x1xf32>
    %115 = vector.extract_strided_slice %106 {offsets = [1, 0], sizes = [1, 64], strides = [1, 1]} : vector<3x64xf32> to vector<1x64xf32>
    %116 = vector.broadcast %114 : vector<32x1xf32> to vector<32x64xf32>
    %117 = vector.broadcast %115 : vector<1x64xf32> to vector<32x64xf32>
    %118 = arith.mulf %116, %117 : vector<32x64xf32>
    %119 = arith.addf %113, %118 : vector<32x64xf32>
    %120 = vector.extract_strided_slice %1 {offsets = [0, 2], sizes = [32, 1], strides = [1, 1]} : vector<32x3xf32> to vector<32x1xf32>
    %121 = vector.extract_strided_slice %106 {offsets = [2, 0], sizes = [1, 64], strides = [1, 1]} : vector<3x64xf32> to vector<1x64xf32>
    %122 = vector.broadcast %120 : vector<32x1xf32> to vector<32x64xf32>
    %123 = vector.broadcast %121 : vector<1x64xf32> to vector<32x64xf32>
    %124 = arith.mulf %122, %123 : vector<32x64xf32>
    %125 = arith.addf %119, %124 : vector<32x64xf32>
    %cst_30 = arith.constant 4.000000e-01 : f32
    %126 = vector.broadcast %cst_30 : f32 to vector<32x64xf32>
    %127 = arith.mulf %126, %125 : vector<32x64xf32>
    %128 = arith.addf %127, %3 : vector<32x64xf32>
    %cst_31 = arith.constant dense<0.000000e+00> : vector<64x64xf32>
    %129 = tpu.matmul %128, %128, %cst_31 {dimension_numbers = #tpu.dot_dimension_numbers<[0], [0], [1], [1], [0, 1, 1, 1], [], []>} : vector<32x64xf32>, vector<32x64xf32>, vector<64x64xf32> -> vector<64x64xf32>
    %cst_32 = arith.constant 0.176776692 : f32
    %130 = vector.broadcast %cst_32 : f32 to vector<64x64xf32>
    %131 = arith.mulf %129, %130 : vector<64x64xf32>
    %cst_33 = arith.constant dense<0xFF800000> : vector<64xf32>
    %132 = vector.multi_reduction <maximumf>, %131, %cst_33 [1] : vector<64x64xf32> to vector<64xf32>
    %133 = vector.shape_cast %132 : vector<64xf32> to vector<64x1xf32>
    %134 = vector.broadcast %133 : vector<64x1xf32> to vector<64x64xf32>
    %135 = arith.subf %131, %134 : vector<64x64xf32>
    %136 = math.exp %135 : vector<64x64xf32>
    %cst_34 = arith.constant dense<0.000000e+00> : vector<64xf32>
    %137 = vector.multi_reduction <add>, %136, %cst_34 [1] : vector<64x64xf32> to vector<64xf32>
    %138 = vector.shape_cast %137 : vector<64xf32> to vector<64x1xf32>
    %139 = vector.broadcast %138 : vector<64x1xf32> to vector<64x64xf32>
    %140 = arith.divf %136, %139 : vector<64x64xf32>
    %cst_35 = arith.constant dense<0.000000e+00> : vector<32x64xf32>
    %141 = tpu.matmul %127, %140, %cst_35 {dimension_numbers = #tpu.dot_dimension_numbers<[1], [1], [0], [0], [0, 0, 1, 0], [], []>} : vector<32x64xf32>, vector<64x64xf32>, vector<32x64xf32> -> vector<32x64xf32>
    %142 = vector.extract_strided_slice %141 {offsets = [0, 0], sizes = [1, 64], strides = [1, 1]} : vector<32x64xf32> to vector<1x64xf32>
    %143 = vector.extract_strided_slice %141 {offsets = [1, 0], sizes = [1, 64], strides = [1, 1]} : vector<32x64xf32> to vector<1x64xf32>
    %144 = tpu.concatenate %142, %143 in 1 : vector<1x64xf32>, vector<1x64xf32> -> vector<1x128xf32>
    %c1 = arith.constant 1 : index
    %c0_36 = arith.constant 0 : index
    %145 = vector.load %arg8[%c1, %c0_36] : memref<2x2048xf32, #tpu.memory_space<vmem>>, vector<1x128xf32>
    tpu.vector_store %arg8[%c1, %c0_36], %144 {strides = array<i32>} : memref<2x2048xf32, #tpu.memory_space<vmem>>, vector<1x128xf32>,
    %146 = vector.extract_strided_slice %141 {offsets = [2, 0], sizes = [1, 64], strides = [1, 1]} : vector<32x64xf32> to vector<1x64xf32>
    %147 = vector.extract_strided_slice %141 {offsets = [3, 0], sizes = [1, 64], strides = [1, 1]} : vector<32x64xf32> to vector<1x64xf32>
    %148 = tpu.concatenate %146, %147 in 1 : vector<1x64xf32>, vector<1x64xf32> -> vector<1x128xf32>
    %c1_37 = arith.constant 1 : index
    %c128_38 = arith.constant 128 : index
    %149 = vector.load %arg8[%c1_37, %c128_38] : memref<2x2048xf32, #tpu.memory_space<vmem>>, vector<1x128xf32>
    tpu.vector_store %arg8[%c1_37, %c128_38], %148 {strides = array<i32>} : memref<2x2048xf32, #tpu.memory_space<vmem>>, vector<1x128xf32>,
    %150 = vector.extract_strided_slice %141 {offsets = [4, 0], sizes = [1, 64], strides = [1, 1]} : vector<32x64xf32> to vector<1x64xf32>
    %151 = vector.extract_strided_slice %141 {offsets = [5, 0], sizes = [1, 64], strides = [1, 1]} : vector<32x64xf32> to vector<1x64xf32>
    %152 = tpu.concatenate %150, %151 in 1 : vector<1x64xf32>, vector<1x64xf32> -> vector<1x128xf32>
    %c1_39 = arith.constant 1 : index
    %c256_40 = arith.constant 256 : index
    %153 = vector.load %arg8[%c1_39, %c256_40] : memref<2x2048xf32, #tpu.memory_space<vmem>>, vector<1x128xf32>
    tpu.vector_store %arg8[%c1_39, %c256_40], %152 {strides = array<i32>} : memref<2x2048xf32, #tpu.memory_space<vmem>>, vector<1x128xf32>,
    %154 = vector.extract_strided_slice %141 {offsets = [6, 0], sizes = [1, 64], strides = [1, 1]} : vector<32x64xf32> to vector<1x64xf32>
    %155 = vector.extract_strided_slice %141 {offsets = [7, 0], sizes = [1, 64], strides = [1, 1]} : vector<32x64xf32> to vector<1x64xf32>
    %156 = tpu.concatenate %154, %155 in 1 : vector<1x64xf32>, vector<1x64xf32> -> vector<1x128xf32>
    %c1_41 = arith.constant 1 : index
    %c384_42 = arith.constant 384 : index
    %157 = vector.load %arg8[%c1_41, %c384_42] : memref<2x2048xf32, #tpu.memory_space<vmem>>, vector<1x128xf32>
    tpu.vector_store %arg8[%c1_41, %c384_42], %156 {strides = array<i32>} : memref<2x2048xf32, #tpu.memory_space<vmem>>, vector<1x128xf32>,
    %158 = vector.extract_strided_slice %141 {offsets = [8, 0], sizes = [1, 64], strides = [1, 1]} : vector<32x64xf32> to vector<1x64xf32>
    %159 = vector.extract_strided_slice %141 {offsets = [9, 0], sizes = [1, 64], strides = [1, 1]} : vector<32x64xf32> to vector<1x64xf32>
    %160 = tpu.concatenate %158, %159 in 1 : vector<1x64xf32>, vector<1x64xf32> -> vector<1x128xf32>
    %c1_43 = arith.constant 1 : index
    %c512_44 = arith.constant 512 : index
    %161 = vector.load %arg8[%c1_43, %c512_44] : memref<2x2048xf32, #tpu.memory_space<vmem>>, vector<1x128xf32>
    tpu.vector_store %arg8[%c1_43, %c512_44], %160 {strides = array<i32>} : memref<2x2048xf32, #tpu.memory_space<vmem>>, vector<1x128xf32>,
    %162 = vector.extract_strided_slice %141 {offsets = [10, 0], sizes = [1, 64], strides = [1, 1]} : vector<32x64xf32> to vector<1x64xf32>
    %163 = vector.extract_strided_slice %141 {offsets = [11, 0], sizes = [1, 64], strides = [1, 1]} : vector<32x64xf32> to vector<1x64xf32>
    %164 = tpu.concatenate %162, %163 in 1 : vector<1x64xf32>, vector<1x64xf32> -> vector<1x128xf32>
    %c1_45 = arith.constant 1 : index
    %c640_46 = arith.constant 640 : index
    %165 = vector.load %arg8[%c1_45, %c640_46] : memref<2x2048xf32, #tpu.memory_space<vmem>>, vector<1x128xf32>
    tpu.vector_store %arg8[%c1_45, %c640_46], %164 {strides = array<i32>} : memref<2x2048xf32, #tpu.memory_space<vmem>>, vector<1x128xf32>,
    %166 = vector.extract_strided_slice %141 {offsets = [12, 0], sizes = [1, 64], strides = [1, 1]} : vector<32x64xf32> to vector<1x64xf32>
    %167 = vector.extract_strided_slice %141 {offsets = [13, 0], sizes = [1, 64], strides = [1, 1]} : vector<32x64xf32> to vector<1x64xf32>
    %168 = tpu.concatenate %166, %167 in 1 : vector<1x64xf32>, vector<1x64xf32> -> vector<1x128xf32>
    %c1_47 = arith.constant 1 : index
    %c768_48 = arith.constant 768 : index
    %169 = vector.load %arg8[%c1_47, %c768_48] : memref<2x2048xf32, #tpu.memory_space<vmem>>, vector<1x128xf32>
    tpu.vector_store %arg8[%c1_47, %c768_48], %168 {strides = array<i32>} : memref<2x2048xf32, #tpu.memory_space<vmem>>, vector<1x128xf32>,
    %170 = vector.extract_strided_slice %141 {offsets = [14, 0], sizes = [1, 64], strides = [1, 1]} : vector<32x64xf32> to vector<1x64xf32>
    %171 = vector.extract_strided_slice %141 {offsets = [15, 0], sizes = [1, 64], strides = [1, 1]} : vector<32x64xf32> to vector<1x64xf32>
    %172 = tpu.concatenate %170, %171 in 1 : vector<1x64xf32>, vector<1x64xf32> -> vector<1x128xf32>
    %c1_49 = arith.constant 1 : index
    %c896_50 = arith.constant 896 : index
    %173 = vector.load %arg8[%c1_49, %c896_50] : memref<2x2048xf32, #tpu.memory_space<vmem>>, vector<1x128xf32>
    tpu.vector_store %arg8[%c1_49, %c896_50], %172 {strides = array<i32>} : memref<2x2048xf32, #tpu.memory_space<vmem>>, vector<1x128xf32>,
    %174 = vector.extract_strided_slice %141 {offsets = [16, 0], sizes = [1, 64], strides = [1, 1]} : vector<32x64xf32> to vector<1x64xf32>
    %175 = vector.extract_strided_slice %141 {offsets = [17, 0], sizes = [1, 64], strides = [1, 1]} : vector<32x64xf32> to vector<1x64xf32>
    %176 = tpu.concatenate %174, %175 in 1 : vector<1x64xf32>, vector<1x64xf32> -> vector<1x128xf32>
    %c1_51 = arith.constant 1 : index
    %c1024_52 = arith.constant 1024 : index
    %177 = vector.load %arg8[%c1_51, %c1024_52] : memref<2x2048xf32, #tpu.memory_space<vmem>>, vector<1x128xf32>
    tpu.vector_store %arg8[%c1_51, %c1024_52], %176 {strides = array<i32>} : memref<2x2048xf32, #tpu.memory_space<vmem>>, vector<1x128xf32>,
    %178 = vector.extract_strided_slice %141 {offsets = [18, 0], sizes = [1, 64], strides = [1, 1]} : vector<32x64xf32> to vector<1x64xf32>
    %179 = vector.extract_strided_slice %141 {offsets = [19, 0], sizes = [1, 64], strides = [1, 1]} : vector<32x64xf32> to vector<1x64xf32>
    %180 = tpu.concatenate %178, %179 in 1 : vector<1x64xf32>, vector<1x64xf32> -> vector<1x128xf32>
    %c1_53 = arith.constant 1 : index
    %c1152_54 = arith.constant 1152 : index
    %181 = vector.load %arg8[%c1_53, %c1152_54] : memref<2x2048xf32, #tpu.memory_space<vmem>>, vector<1x128xf32>
    tpu.vector_store %arg8[%c1_53, %c1152_54], %180 {strides = array<i32>} : memref<2x2048xf32, #tpu.memory_space<vmem>>, vector<1x128xf32>,
    %182 = vector.extract_strided_slice %141 {offsets = [20, 0], sizes = [1, 64], strides = [1, 1]} : vector<32x64xf32> to vector<1x64xf32>
    %183 = vector.extract_strided_slice %141 {offsets = [21, 0], sizes = [1, 64], strides = [1, 1]} : vector<32x64xf32> to vector<1x64xf32>
    %184 = tpu.concatenate %182, %183 in 1 : vector<1x64xf32>, vector<1x64xf32> -> vector<1x128xf32>
    %c1_55 = arith.constant 1 : index
    %c1280_56 = arith.constant 1280 : index
    %185 = vector.load %arg8[%c1_55, %c1280_56] : memref<2x2048xf32, #tpu.memory_space<vmem>>, vector<1x128xf32>
    tpu.vector_store %arg8[%c1_55, %c1280_56], %184 {strides = array<i32>} : memref<2x2048xf32, #tpu.memory_space<vmem>>, vector<1x128xf32>,
    %186 = vector.extract_strided_slice %141 {offsets = [22, 0], sizes = [1, 64], strides = [1, 1]} : vector<32x64xf32> to vector<1x64xf32>
    %187 = vector.extract_strided_slice %141 {offsets = [23, 0], sizes = [1, 64], strides = [1, 1]} : vector<32x64xf32> to vector<1x64xf32>
    %188 = tpu.concatenate %186, %187 in 1 : vector<1x64xf32>, vector<1x64xf32> -> vector<1x128xf32>
    %c1_57 = arith.constant 1 : index
    %c1408_58 = arith.constant 1408 : index
    %189 = vector.load %arg8[%c1_57, %c1408_58] : memref<2x2048xf32, #tpu.memory_space<vmem>>, vector<1x128xf32>
    tpu.vector_store %arg8[%c1_57, %c1408_58], %188 {strides = array<i32>} : memref<2x2048xf32, #tpu.memory_space<vmem>>, vector<1x128xf32>,
    %190 = vector.extract_strided_slice %141 {offsets = [24, 0], sizes = [1, 64], strides = [1, 1]} : vector<32x64xf32> to vector<1x64xf32>
    %191 = vector.extract_strided_slice %141 {offsets = [25, 0], sizes = [1, 64], strides = [1, 1]} : vector<32x64xf32> to vector<1x64xf32>
    %192 = tpu.concatenate %190, %191 in 1 : vector<1x64xf32>, vector<1x64xf32> -> vector<1x128xf32>
    %c1_59 = arith.constant 1 : index
    %c1536_60 = arith.constant 1536 : index
    %193 = vector.load %arg8[%c1_59, %c1536_60] : memref<2x2048xf32, #tpu.memory_space<vmem>>, vector<1x128xf32>
    tpu.vector_store %arg8[%c1_59, %c1536_60], %192 {strides = array<i32>} : memref<2x2048xf32, #tpu.memory_space<vmem>>, vector<1x128xf32>,
    %194 = vector.extract_strided_slice %141 {offsets = [26, 0], sizes = [1, 64], strides = [1, 1]} : vector<32x64xf32> to vector<1x64xf32>
    %195 = vector.extract_strided_slice %141 {offsets = [27, 0], sizes = [1, 64], strides = [1, 1]} : vector<32x64xf32> to vector<1x64xf32>
    %196 = tpu.concatenate %194, %195 in 1 : vector<1x64xf32>, vector<1x64xf32> -> vector<1x128xf32>
    %c1_61 = arith.constant 1 : index
    %c1664_62 = arith.constant 1664 : index
    %197 = vector.load %arg8[%c1_61, %c1664_62] : memref<2x2048xf32, #tpu.memory_space<vmem>>, vector<1x128xf32>
    tpu.vector_store %arg8[%c1_61, %c1664_62], %196 {strides = array<i32>} : memref<2x2048xf32, #tpu.memory_space<vmem>>, vector<1x128xf32>,
    %198 = vector.extract_strided_slice %141 {offsets = [28, 0], sizes = [1, 64], strides = [1, 1]} : vector<32x64xf32> to vector<1x64xf32>
    %199 = vector.extract_strided_slice %141 {offsets = [29, 0], sizes = [1, 64], strides = [1, 1]} : vector<32x64xf32> to vector<1x64xf32>
    %200 = tpu.concatenate %198, %199 in 1 : vector<1x64xf32>, vector<1x64xf32> -> vector<1x128xf32>
    %c1_63 = arith.constant 1 : index
    %c1792_64 = arith.constant 1792 : index
    %201 = vector.load %arg8[%c1_63, %c1792_64] : memref<2x2048xf32, #tpu.memory_space<vmem>>, vector<1x128xf32>
    tpu.vector_store %arg8[%c1_63, %c1792_64], %200 {strides = array<i32>} : memref<2x2048xf32, #tpu.memory_space<vmem>>, vector<1x128xf32>,
    %202 = vector.extract_strided_slice %141 {offsets = [30, 0], sizes = [1, 64], strides = [1, 1]} : vector<32x64xf32> to vector<1x64xf32>
    %203 = vector.extract_strided_slice %141 {offsets = [31, 0], sizes = [1, 64], strides = [1, 1]} : vector<32x64xf32> to vector<1x64xf32>
    %204 = tpu.concatenate %202, %203 in 1 : vector<1x64xf32>, vector<1x64xf32> -> vector<1x128xf32>
    %c1_65 = arith.constant 1 : index
    %c1920_66 = arith.constant 1920 : index
    %205 = vector.load %arg8[%c1_65, %c1920_66] : memref<2x2048xf32, #tpu.memory_space<vmem>>, vector<1x128xf32>
    tpu.vector_store %arg8[%c1_65, %c1920_66], %204 {strides = array<i32>} : memref<2x2048xf32, #tpu.memory_space<vmem>>, vector<1x128xf32>,
    %c0_67 = arith.constant 0 : index
    %c0_68 = arith.constant 0 : index
    %206 = vector.load %arg8[%c0_67, %c0_68] : memref<2x2048xf32, #tpu.memory_space<vmem>>, vector<2x2048xf32>
    %c0_69 = arith.constant 0 : index
    %c0_70 = arith.constant 0 : index
    %207 = vector.load %arg5[%c0_69, %c0_70] : memref<2048x10xf32, #tpu.memory_space<vmem>>, vector<2048x10xf32>
    %cst_71 = arith.constant dense<0.000000e+00> : vector<2x10xf32>
    %208 = tpu.matmul %206, %207, %cst_71 {dimension_numbers = #tpu.dot_dimension_numbers<[1], [0], [0], [1], [0, 0, 1, 1], [], []>} : vector<2x2048xf32>, vector<2048x10xf32>, vector<2x10xf32> -> vector<2x10xf32>
    %c0_72 = arith.constant 0 : index
    %c0_73 = arith.constant 0 : index
    %209 = vector.load %arg6[%c0_72, %c0_73] : memref<1x10xf32, #tpu.memory_space<vmem>>, vector<1x10xf32>
    %210 = vector.broadcast %209 : vector<1x10xf32> to vector<2x10xf32>
    %211 = arith.addf %208, %210 : vector<2x10xf32>
    %c0_74 = arith.constant 0 : index
    %c0_75 = arith.constant 0 : index
    %212 = vector.load %arg7[%c0_74, %c0_75] : memref<2x10xf32, #tpu.memory_space<vmem>>, vector<2x10xf32>
    tpu.vector_store %arg7[%c0_74, %c0_75], %211 {strides = array<i32>} : memref<2x10xf32, #tpu.memory_space<vmem>>, vector<2x10xf32>,
    return
  }
  func.func @transform_0(%arg0: i32) -> (i32, i32, i32) {
    %c0_i32 = arith.constant 0 : i32
    %c0_i32_0 = arith.constant 0 : i32
    %c0_i32_1 = arith.constant 0 : i32
    %c0_i32_2 = arith.constant 0 : i32
    return %c0_i32, %c0_i32_0, %c0_i32_1 : i32, i32, i32
  }
  func.func @transform_1(%arg0: i32) -> (i32, i32) {
    %c0_i32 = arith.constant 0 : i32
    %c0_i32_0 = arith.constant 0 : i32
    %c0_i32_1 = arith.constant 0 : i32
    return %c0_i32, %c0_i32_0 : i32, i32
  }
  func.func @transform_2(%arg0: i32) -> (i32, i32) {
    %c0_i32 = arith.constant 0 : i32
    %c0_i32_0 = arith.constant 0 : i32
    %c0_i32_1 = arith.constant 0 : i32
    return %c0_i32, %c0_i32_0 : i32, i32
  }
  func.func @transform_3(%arg0: i32) -> (i32, i32) {
    %c0_i32 = arith.constant 0 : i32
    %c0_i32_0 = arith.constant 0 : i32
    %c0_i32_1 = arith.constant 0 : i32
    return %c0_i32, %c0_i32_0 : i32, i32
  }
  func.func @transform_4(%arg0: i32) -> (i32, i32) {
    %c0_i32 = arith.constant 0 : i32
    %c0_i32_0 = arith.constant 0 : i32
    %c0_i32_1 = arith.constant 0 : i32
    return %c0_i32, %c0_i32_0 : i32, i32
  }
  func.func @transform_5(%arg0: i32) -> (i32, i32) {
    %c0_i32 = arith.constant 0 : i32
    %c0_i32_0 = arith.constant 0 : i32
    %c0_i32_1 = arith.constant 0 : i32
    return %c0_i32, %c0_i32_0 : i32, i32
  }
  func.func @transform_6(%arg0: i32) -> (i32, i32) {
    %c0_i32 = arith.constant 0 : i32
    %c0_i32_0 = arith.constant 0 : i32
    %c0_i32_1 = arith.constant 0 : i32
    return %c0_i32, %c0_i32_0 : i32, i32
  }
}

</mosaic_0001>

<bundles_post_ra>
// kernel: joiner_forward.1
= control target key start
LH: loop header
LB: loop body
LE: loop exit
PB: predicated region body
PF: predicated region fallthrough
CT: control target
= control target key end

     0   :  { %v1883_v2 = vmov 1   ;;  %s3166_s0 = inlined_call_operand.vmem [shape: f32[2,3,64], index: 0, kind: input, shape index: {}]   ;;  %s3167_s1 = inlined_call_operand.vmem [shape: f32[32,3], index: 1, kind: input, shape index: {}]   ;;  %s3168_s2 = inlined_call_operand.vmem [shape: f32[32,1], index: 2, kind: input, shape index: {}]   ;;  %s3169_s3 = inlined_call_operand.vmem [shape: f32[32,64], index: 3, kind: input, shape index: {}]   ;;  %s3170_s4 = inlined_call_operand.vmem [shape: f32[2048,10], index: 4, kind: input, shape index: {}]   ;;  %s3171_s5 = inlined_call_operand.vmem [shape: f32[1,10], index: 5, kind: input, shape index: {}]   ;;  %s3172_s6 = inlined_call_operand.hbm [shape: f32[2,10], index: 6, kind: output, shape index: {}]  }
   0x1   :  { %v27_v0 = vld [vmem:[%s3167_s1 + $0x8] sm:$0xff]  ;;  %v26_v1 = vld [vmem:[%s3167_s1] sm:$0xff]  ;;  %1783 = vset.pattern.permute.xlu0 %v1883_v2  ;;  %1779 = vset.pattern.permute.xlu1 %v1883_v2 }
   0x2   :  { %92 = vperm.xlu0 %1783, %v27_v0   ;;  %88 = vperm.xlu1 %1779, %v26_v1  }
   0x3   :  { %11 = vsyncpa [#allocation4], 0  ;;  %v1884_v3 = vmov 2   ;;  %v1885_v4 = vmov 0   ;;  %v31_v5 = vld [vmem:[%s3168_s2 + $0x8] sm:$0xff]  ;;  %v30_v6 = vld [vmem:[%s3168_s2] sm:$0xff] }
   0x4   :  { %1781 = vset.pattern.permute.xlu2 %v1884_v3  ;;  %v28_v7 = vld [vmem:[%s3167_s1 + $0x10] sm:$0xff]  ;;  %v29_v8 = vld [vmem:[%s3167_s1 + $0x18] sm:$0xff]  ;;  %v24_v15 = vld [vmem:[%s3166_s0] sm:$0x7]  ;;  %vm177_vm0 = vcmask 261120   ;;  %vm251_vm1 = vcmask 523264  }
   0x5   :  { %113 = vperm.xlu2 %1781, %v26_v1   ;;  %v32_v9 = vld [vmem:[%s3168_s2 + $0x10] sm:$0xff]  ;;  %v33_v10 = vld [vmem:[%s3168_s2 + $0x18] sm:$0xff]  ;;  %v25_v16 = vld [vmem:[%s3166_s0 + $0x4] sm:$0x7]  ;;  %v1957_v19 = vperm.slane %v24_v15, 0  ;;  %v1961_v22 = vperm.slane %v24_v15, 1 }
   0x6   :  { %v1959_v20 = vperm.slane %v25_v16, 0  ;;  %v1963_v23 = vperm.slane %v25_v16, 1  ;;  %v1967_v26 = vperm.slane %v24_v15, 2  ;;  %v1969_v27 = vperm.slane %v25_v16, 2  ;;  %v34_v51 = vld [vmem:[%s3169_s3] sm:$0xff]  ;;  %v35_v63 = vld [vmem:[%s3169_s3 + $0x8] sm:$0xff] }
   0x7   :  { %v36_v16 = vld [vmem:[%s3169_s3 + $0x10] sm:$0xff]  ;;  %s1724_s10 = sshll.u32 %s3172_s6, 4  ;;  %s1725_s10 = int_to_ptr.hbm [resolvable:$true] %s1724_s10 }
   0xa   :  { %1784 = vset.pattern.permute.xlu0 %v1885_v4  ;;  %1780 = vset.pattern.permute.xlu1 %v1885_v4 }
   0xb   :  { %40 = vperm.xlu0 %1784, %v26_v1   ;;  %45 = vperm.xlu1 %1780, %v27_v0  }
   0xd   :  { %1782 = vset.pattern.permute.xlu2 %v1885_v4 }
   0xe   :  { %70 = vperm.xlu2 %1782, %v31_v5  }
  0x13   :  { %65 = vperm.xlu0 %1784, %v30_v6   ;;  %50 = vperm.xlu1 %1780, %v28_v7  }
  0x16   :  { %1785 = vset.pattern.permute.xlu2 %v1884_v3 }
  0x17   :  { %117 = vperm.xlu2 %1785, %v27_v0  }
  0x1b   :  { %55 = vperm.xlu0 %1784, %v29_v8   ;;  %75 = vperm.xlu1 %1780, %v32_v9  }
  0x1f   :  { %1786 = vset.pattern.permute.xlu2 %v1883_v2 }
  0x20   :  { %96 = vperm.xlu2 %1786, %v28_v7  }
  0x23   :  { %1787 = vset.pattern.permute.xlu1 %v1884_v3 }
  0x24   :  { %121 = vperm.xlu1 %1787, %v28_v7  }
  0x28   :  { %1788 = vset.pattern.permute.xlu2 %v1885_v4 }
  0x29   :  { %80 = vperm.xlu2 %1788, %v33_v10  }
  0x2c   :  { %1789 = vset.pattern.permute.xlu1 %v1883_v2 }
  0x2d   :  { %100 = vperm.xlu1 %1789, %v29_v8  }
  0x31   :  { %1790 = vset.pattern.permute.xlu2 %v1884_v3 }
  0x32   :  { %125 = vperm.xlu2 %1790, %v29_v8  }
  0x5f   :  { %v114_v11 = vpop.permute.xlu2 %113 }
  0x60   :  { %v129_v38 = vmul.f32 %v1967_v26, %v114_v11  ;;  %v620_v39 = vmul.f32 %v1969_v27, %v114_v11 }
  0x68   :  { %v71_v14 = vpop.permute.xlu2 %70 }
  0x71   :  { %v118_v21 = vpop.permute.xlu2 %117 }
  0x72   :  { %v130_v44 = vmul.f32 %v1967_v26, %v118_v21  ;;  %v621_v45 = vmul.f32 %v1969_v27, %v118_v21 }
  0x74   :  { %v89_v12 = vpop.permute.xlu1 %88  ;;  %v93_v13 = vpop.permute.xlu0 %92 }
  0x75   :  { %v104_v30 = vmul.f32 %v1961_v22, %v89_v12  ;;  %v611_v31 = vmul.f32 %v1963_v23, %v89_v12  ;;  %v105_v40 = vmul.f32 %v1961_v22, %v93_v13  ;;  %v612_v41 = vmul.f32 %v1963_v23, %v93_v13 }
  0x7a   :  { %v97_v50 = vpop.permute.xlu2 %96 }
  0x7b   :  { %v106_v0 = vmul.f32 %v1961_v22, %v97_v50  ;;  %v613_v1 = vmul.f32 %v1963_v23, %v97_v50 }
  0x7d   :  { %v41_v17 = vpop.permute.xlu0 %40  ;;  %v46_v18 = vpop.permute.xlu1 %45 }
  0x7e   :  { %v60_v24 = vmul.f32 %v1957_v19, %v46_v18  ;;  %v603_v25 = vmul.f32 %v1959_v20, %v46_v18  ;;  %v59_v28 = vmul.f32 %v1957_v19, %v41_v17  ;;  %v602_v29 = vmul.f32 %v1959_v20, %v41_v17 }
  0x80   :  { %v84_v34 = vadd.f32 %v71_v14, %v60_v24  ;;  %v607_v35 = vadd.f32 %v603_v25, %v71_v14 }
  0x82   :  { %v109_v46 = vadd.f32 %v105_v40, %v84_v34  ;;  %v616_v47 = vadd.f32 %v612_v41, %v607_v35 }
  0x83   :  { %v81_v5 = vpop.permute.xlu2 %80 }
  0x84   :  { %v134_v55 = vadd.f32 %v130_v44, %v109_v46  ;;  %v625_v56 = vadd.f32 %v621_v45, %v616_v47 }
  0x85   :  { %v66_v32 = vpop.permute.xlu0 %65  ;;  %v51_v33 = vpop.permute.xlu1 %50 }
  0x86   :  { %v83_v36 = vadd.f32 %v66_v32, %v59_v28  ;;  %v606_v37 = vadd.f32 %v602_v29, %v66_v32  ;;  %v61_v59 = vmul.f32 %v1957_v19, %v51_v33  ;;  %v604_v60 = vmul.f32 %v1959_v20, %v51_v33 }
  0x87   :  { %v1992_v61 = vmul.f32 0.4, %v134_v55  ;;  %v1994_v62 = vmul.f32 0.4, %v625_v56 }
  0x88   :  { %v108_v42 = vadd.f32 %v104_v30, %v83_v36  ;;  %v615_v43 = vadd.f32 %v611_v31, %v606_v37 }
  0x89   :  { %v142_v6 = vadd.f32 %v1992_v61, %v35_v63  ;;  %v633_v7 = vadd.f32 %v1994_v62, %v35_v63 }
  0x8a   :  { %v133_v48 = vadd.f32 %v129_v38, %v108_v42  ;;  %v624_v49 = vadd.f32 %v620_v39, %v615_v43  ;;  %v37_v39 = vld [vmem:[%s3169_s3 + $0x18] sm:$0xff]  ;;  %s1886_s3 = smov 64  }
  0x8c   :  { %v1984_v52 = vmul.f32 0.4, %v624_v49  ;;  %v1986_v53 = vmul.f32 0.4, %v133_v48  ;;  %v126_v25 = vpop.permute.xlu2 %125 }
  0x8d   :  { %v76_v54 = vpop.permute.xlu1 %75  ;;  %v56_v13 = vpop.permute.xlu0 %55  ;;  %v132_v31 = vmul.f32 %v1967_v26, %v126_v25  ;;  %v623_v32 = vmul.f32 %v1969_v27, %v126_v25 }
  0x8e   :  { %v632_v57 = vadd.f32 %v1984_v52, %v34_v51  ;;  %v141_v58 = vadd.f32 %v1986_v53, %v34_v51  ;;  %v85_v2 = vadd.f32 %v76_v54, %v61_v59  ;;  %v608_v4 = vadd.f32 %v604_v60, %v76_v54 }
  0x8f   :  { %v62_v21 = vmul.f32 %v1957_v19, %v56_v13  ;;  %v605_v24 = vmul.f32 %v1959_v20, %v56_v13 }
  0x90   :  { %636 = vxpose.xlu1.b32.start [1/4] (short) (narrow) %v632_v57, 64  ;;  %145 = vxpose.xlu0.b32.start [1/4] (short) (narrow) %v141_v58, 64  ;;  %v110_v9 = vadd.f32 %v106_v0, %v85_v2  ;;  %v617_v10 = vadd.f32 %v613_v1, %v608_v4 }
  0x91   :  { %v86_v33 = vadd.f32 %v81_v5, %v62_v21  ;;  %v609_v34 = vadd.f32 %v605_v24, %v81_v5 }
  0x96   :  { %v122_v8 = vpop.permute.xlu1 %121 }
  0x97   :  { %v131_v11 = vmul.f32 %v1967_v26, %v122_v8  ;;  %v622_v12 = vmul.f32 %v1969_v27, %v122_v8 }
  0x98   :  { %637 = vxpose.xlu1.b32.cont [2/4] (short) (narrow) %v633_v7, 64  ;;  %146 = vxpose.xlu0.b32.cont [2/4] (short) (narrow) %v142_v6, 64 }
  0x99   :  { %v135_v14 = vadd.f32 %v131_v11, %v110_v9  ;;  %v626_v15 = vadd.f32 %v622_v12, %v617_v10 }
  0x9b   :  { %v2008_v17 = vmul.f32 0.4, %v135_v14  ;;  %v2010_v18 = vmul.f32 0.4, %v626_v15 }
  0x9d   :  { %v143_v28 = vadd.f32 %v2008_v17, %v36_v16  ;;  %v634_v29 = vadd.f32 %v2010_v18, %v36_v16 }
  0x9f   :  { %v101_v30 = vpop.permute.xlu1 %100 }
  0xa0   :  { %v107_v35 = vmul.f32 %v1961_v22, %v101_v30  ;;  %v614_v36 = vmul.f32 %v1963_v23, %v101_v30  ;;  %638 = vxpose.xlu1.b32.cont [3/4] (short) (narrow) %v634_v29, 64  ;;  %147 = vxpose.xlu0.b32.cont [3/4] (short) (narrow) %v143_v28, 64 }
  0xa2   :  { %v111_v19 = vadd.f32 %v107_v35, %v86_v33  ;;  %v618_v20 = vadd.f32 %v614_v36, %v609_v34 }
  0xa4   :  { %v136_v37 = vadd.f32 %v132_v31, %v111_v19  ;;  %v627_v38 = vadd.f32 %v623_v32, %v618_v20 }
  0xa6   :  { %v2023_v40 = vmul.f32 0.4, %v627_v38  ;;  %v2025_v26 = vmul.f32 0.4, %v136_v37 }
  0xa8   :  { %v635_v27 = vadd.f32 %v2023_v40, %v37_v39  ;;  %v144_v22 = vadd.f32 %v2025_v26, %v37_v39 }
  0xaa   :  { %704 = vmatpush.msra.mxu2 %v635_v27  ;;  %639 = vxpose.xlu1.b32.end [4/4] (short) (narrow) %v635_v27, 64 }
  0xab   :  { %214 = vmatpush.msra.mxu0 %v144_v22  ;;  %148 = vxpose.xlu0.b32.end [4/4] (short) (narrow) %v144_v22, 64 }
  0xac   :  { %705 = vmatpush.msra.mxu2 %v634_v29 }
  0xad   :  { %215 = vmatpush.msra.mxu0 %v143_v28 }
  0xae   :  { %706 = vmatpush.msra.mxu2 %v633_v7 }
  0xaf   :  { %216 = vmatpush.msra.mxu0 %v142_v6 }
  0xb0   :  { %707 = vmatpush.msra.mxu2 %v632_v57 }
  0xb1   :  { %217 = vmatpush.msra.mxu0 %v141_v58 }
 0x112   :  { %1791 = vset.pattern.permute.xlu0 %v1884_v3 }
 0x136   :  { %v652_v47 = vpop.trf.xlu1 }
 0x137   :  { %v161_v23 = vpop.trf.xlu0  ;;  %1753 = vmatmul.msk.f32.vlgmr.msra.gmra.mxu2 %vm177_vm0, %v652_v47 }
 0x138   :  { %1733 = vmatmul.msk.f32.vlgmr.msra.gmra.mxu0 %vm177_vm0, %v161_v23 }
 0x13e   :  { %v653_v50 = vpop.trf.xlu1 }
 0x13f   :  { %v162_v41 = vpop.trf.xlu0  ;;  %1754 = vmatmul.msk.f32.gmra.mxu2 %vm177_vm0, %v653_v50 }
 0x140   :  { %1734 = vmatmul.msk.f32.gmra.mxu0 %vm177_vm0, %v162_v41 }
 0x146   :  { %v654_v55 = vpop.trf.xlu1 }
 0x147   :  { %v163_v42 = vpop.trf.xlu0  ;;  %1755 = vmatmul.msk.f32.gmra.mxu2 %vm177_vm0, %v654_v55 }
 0x148   :  { %1735 = vmatmul.msk.f32.gmra.mxu0 %vm177_vm0, %v163_v42 }
 0x14e   :  { %v655_v58 = vpop.trf.xlu1 }
 0x14f   :  { %v164_v43 = vpop.trf.xlu0  ;;  %1756 = vmatmul.msk.f32.gmra.mxu2 %vm177_vm0, %v655_v58 }
 0x150   :  { %1736 = vmatmul.msk.f32.gmra.mxu0 %vm177_vm0, %v164_v43 }
 0x156   :  { %v656_v1 = vpop.trf.xlu1 }
 0x157   :  { %v165_v44 = vpop.trf.xlu0  ;;  %1757 = vmatmul.msk.f32.gmra.mxu2 %vm177_vm0, %v656_v1 }
 0x158   :  { %1737 = vmatmul.msk.f32.gmra.mxu0 %vm177_vm0, %v165_v44 }
 0x15e   :  { %v657_v7 = vpop.trf.xlu1 }
 0x15f   :  { %v166_v45 = vpop.trf.xlu0  ;;  %1758 = vmatmul.msk.f32.gmra.mxu2 %vm177_vm0, %v657_v7 }
 0x160   :  { %1738 = vmatmul.msk.f32.gmra.mxu0 %vm177_vm0, %v166_v45 }
 0x166   :  { %v658_v11 = vpop.trf.xlu1 }
 0x167   :  { %v167_v3 = vpop.trf.xlu0  ;;  %1759 = vmatmul.msk.f32.gmra.mxu2 %vm177_vm0, %v658_v11 }
 0x168   :  { %1739 = vmatmul.msk.f32.gmra.mxu0 %vm177_vm0, %v167_v3 }
 0x16e   :  { %v659_v15 = vpop.trf.xlu1 }
 0x16f   :  { %v168_v46 = vpop.trf.xlu0  ;;  %1760 = vmatmul.msk.f32.gmra.mxu2 %vm177_vm0, %v659_v15 }
 0x170   :  { %1740 = vmatmul.msk.f32.gmra.mxu0 %vm177_vm0, %v168_v46 }
 0x1b5   :  { %v219_v48 = vpop.f32.mrf.mxu0 }
 0x1b6   :  { %v2039_v49 = vmul.f32 0.17677669, %v219_v48 }
 0x1b8   :  { %v252_v51 = vsel %vm251_vm1, %v2039_v49, -inf }
 0x1b9   :  { %253 = vmax.xlane.f32.xlu1 %v252_v51 }
 0x1ba   :  { %v2057_v29 = vpop.f32.mrf.mxu2 }
 0x1bd   :  { %v222_v54 = vpop.f32.mrf.mxu0 }
 0x1be   :  { %v244_v60 = vmul.f32 0.17677669, %v222_v54 }
 0x1c0   :  { %v255_v2 = vsel %vm251_vm1, %v244_v60, -inf }
 0x1c2   :  { %v2059_v35 = vpop.f32.mrf.mxu2 }
 0x1c5   :  { %v225_v56 = vpop.f32.mrf.mxu0 }
 0x1c6   :  { %v245_v57 = vmul.f32 0.17677669, %v225_v56 }
 0x1c8   :  { %v258_v59 = vsel %vm251_vm1, %v245_v57, -inf }
 0x1c9   :  { %259 = vmax.xlane.f32.xlu2 %v258_v59 }
 0x1ca   :  { %v715_v22 = vpop.f32.mrf.mxu2 }
 0x1cd   :  { %v228_v63 = vpop.f32.mrf.mxu0 }
 0x1ce   :  { %v246_v0 = vmul.f32 0.17677669, %v228_v63 }
 0x1d0   :  { %v261_v4 = vsel %vm251_vm1, %v246_v0, -inf }
 0x1d1   :  { %256 = vmax.xlane.f32.xlu2 %v255_v2  ;;  %262 = vmax.xlane.f32.xlu0 %v261_v4 }
 0x1d2   :  { %v718_v3 = vpop.f32.mrf.mxu2 }
 0x1d5   :  { %v231_v5 = vpop.f32.mrf.mxu0 }
 0x1d6   :  { %v247_v6 = vmul.f32 0.17677669, %v231_v5 }
 0x1d8   :  { %v264_v8 = vsel %vm251_vm1, %v247_v6, -inf }
 0x1d9   :  { %265 = vmax.xlane.f32.xlu2 %v264_v8 }
 0x1da   :  { %v721_v55 = vpop.f32.mrf.mxu2 }
 0x1dd   :  { %v234_v9 = vpop.f32.mrf.mxu0 }
 0x1de   :  { %v248_v10 = vmul.f32 0.17677669, %v234_v9 }
 0x1e0   :  { %v267_v12 = vsel %vm251_vm1, %v248_v10, -inf }
 0x1e1   :  { %268 = vmax.xlane.f32.xlu2 %v267_v12 }
 0x1e5   :  { %v237_v13 = vpop.f32.mrf.mxu0 }
 0x1e6   :  { %v249_v14 = vmul.f32 0.17677669, %v237_v13 }
 0x1e8   :  { %v270_v16 = vsel %vm251_vm1, %v249_v14, -inf }
 0x1e9   :  { %271 = vmax.xlane.f32.xlu2 %v270_v16 }
 0x1ed   :  { %v240_v21 = vpop.f32.mrf.mxu0 }
 0x1ee   :  { %v250_v24 = vmul.f32 0.17677669, %v240_v21 }
 0x1f0   :  { %v273_v25 = vsel %vm251_vm1, %v250_v24, -inf }
 0x1f1   :  { %274 = vmax.xlane.f32.xlu2 %v273_v25 }
 0x22c   :  { %v254_v1 = vpop.xlane.xlu1 %253 }
 0x22d   :  { %v276_v4 = vsub.f32 %v2039_v49, %v254_v1 }
 0x23c   :  { %v260_v28 = vpop.xlane.xlu2 %259 }
 0x23d   :  { %v278_v32 = vsub.f32 %v245_v57, %v260_v28  ;;  %v2110_v28 = vmul.f32 0.17677669, %v718_v3 }
 0x23f   :  { %v288_v34 = vmul.f32 1.442695, %v278_v32 }
 0x244   :  { %v257_v30 = vpop.xlane.xlu2 %256  ;;  %v263_v36 = vpop.xlane.xlu0 %262 }
 0x245   :  { %v277_v31 = vsub.f32 %v244_v60, %v257_v30  ;;  %v279_v37 = vsub.f32 %v246_v0, %v263_v36  ;;  %v724_v0 = vpop.f32.mrf.mxu2  ;;  %v750_v30 = vsel %vm251_vm1, %v2110_v28, -inf  ;;  %v2124_v36 = vmul.f32 0.17677669, %v2057_v29 }
 0x246   :  { %v2102_v16 = vmul.f32 0.17677669, %v724_v0 }
 0x247   :  { %v286_v33 = vmul.f32 1.442695, %v277_v31  ;;  %v290_v39 = vmul.f32 1.442695, %v279_v37  ;;  %v2114_v31 = vmul.f32 0.17677669, %v715_v22 }
 0x248   :  { %v756_v21 = vsel %vm251_vm1, %v2102_v16, -inf  ;;  %v741_v37 = vsel %vm251_vm1, %v2124_v36, -inf }
 0x249   :  { %1793 = vpow2.f32 %v286_v33  ;;  %v747_v32 = vsel %vm251_vm1, %v2114_v31, -inf  ;;  %v2119_v33 = vmul.f32 0.17677669, %v2059_v35 }
 0x24a   :  { %1795 = vpow2.f32 %v288_v34 }
 0x24b   :  { %1797 = vpow2.f32 %v290_v39  ;;  %v744_v34 = vsel %vm251_vm1, %v2119_v33, -inf }
 0x24c   :  { %v266_v19 = vpop.xlane.xlu2 %265 }
 0x24d   :  { %v280_v23 = vsub.f32 %v247_v6, %v266_v19  ;;  %v284_v6 = vmul.f32 1.442695, %v276_v4  ;;  %v727_v8 = vpop.f32.mrf.mxu2 }
 0x24f   :  { %v2061_v20 = vpop.eup %1793  ;;  %v292_v43 = vmul.f32 1.442695, %v280_v23 }
 0x250   :  { %v303_v38 = vsel %vm251_vm1, %v2061_v20, 0.0  ;;  %v2065_v27 = vpop.eup %1795 }
 0x251   :  { %304 = vadd.xlane.f32.xlu2 %v303_v38  ;;  %v306_v42 = vsel %vm251_vm1, %v2065_v27, 0.0  ;;  %v2069_v44 = vpop.eup %1797  ;;  %1799 = vpow2.f32 %v292_v43 }
 0x252   :  { %v309_v46 = vsel %vm251_vm1, %v2069_v44, 0.0 }
 0x254   :  { %v269_v41 = vpop.xlane.xlu2 %268 }
 0x255   :  { %v281_v45 = vsub.f32 %v248_v10, %v269_v41  ;;  %v730_v11 = vpop.f32.mrf.mxu2 }
 0x256   :  { %v2094_v12 = vmul.f32 0.17677669, %v730_v11 }
 0x257   :  { %v294_v48 = vmul.f32 1.442695, %v281_v45  ;;  %v2073_v50 = vpop.eup %1799 }
 0x258   :  { %v312_v54 = vsel %vm251_vm1, %v2073_v50, 0.0  ;;  %v762_v13 = vsel %vm251_vm1, %v2094_v12, -inf }
 0x259   :  { %307 = vadd.xlane.f32.xlu2 %v306_v42  ;;  %1801 = vpow2.f32 %v294_v48 }
 0x25c   :  { %v272_v47 = vpop.xlane.xlu2 %271 }
 0x25d   :  { %v282_v51 = vsub.f32 %v249_v14, %v272_v47  ;;  %v2098_v14 = vmul.f32 0.17677669, %v727_v8 }
 0x25f   :  { %v296_v56 = vmul.f32 1.442695, %v282_v51  ;;  %v2077_v58 = vpop.eup %1801  ;;  %v759_v15 = vsel %vm251_vm1, %v2098_v14, -inf }
 0x260   :  { %v315_v60 = vsel %vm251_vm1, %v2077_v58, 0.0 }
 0x261   :  { %310 = vadd.xlane.f32.xlu2 %v309_v46  ;;  %1803 = vpow2.f32 %v296_v56 }
 0x264   :  { %v275_v57 = vpop.xlane.xlu2 %274 }
 0x265   :  { %v283_v59 = vsub.f32 %v250_v24, %v275_v57  ;;  %v2106_v24 = vmul.f32 0.17677669, %v721_v55 }
 0x267   :  { %v298_v63 = vmul.f32 1.442695, %v283_v59  ;;  %v2081_v2 = vpop.eup %1803  ;;  %v753_v25 = vsel %vm251_vm1, %v2106_v24, -inf }
 0x268   :  { %v318_v5 = vsel %vm251_vm1, %v2081_v2, 0.0 }
 0x269   :  { %313 = vadd.xlane.f32.xlu2 %v312_v54  ;;  %1805 = vpow2.f32 %v298_v63 }
 0x26a   :  { %1807 = vpow2.f32 %v284_v6 }
 0x26f   :  { %v2086_v7 = vpop.eup %1805 }
 0x270   :  { %v321_v9 = vsel %vm251_vm1, %v2086_v7, 0.0  ;;  %v2090_v10 = vpop.eup %1807 }
 0x271   :  { %316 = vadd.xlane.f32.xlu2 %v315_v60  ;;  %v300_v49 = vsel %vm251_vm1, %v2090_v10, 0.0 }
 0x279   :  { %319 = vadd.xlane.f32.xlu2 %v318_v5 }
 0x281   :  { %322 = vadd.xlane.f32.xlu2 %v321_v9 }
 0x289   :  { %301 = vadd.xlane.f32.xlu2 %v300_v49 }
 0x291   :  { %763 = vmax.xlane.f32.xlu2 %v762_v13 }
 0x299   :  { %760 = vmax.xlane.f32.xlu2 %v759_v15 }
 0x2a1   :  { %757 = vmax.xlane.f32.xlu2 %v756_v21 }
 0x2a9   :  { %754 = vmax.xlane.f32.xlu2 %v753_v25 }
 0x2b1   :  { %751 = vmax.xlane.f32.xlu2 %v750_v30 }
 0x2b9   :  { %748 = vmax.xlane.f32.xlu2 %v747_v32 }
 0x2c1   :  { %745 = vmax.xlane.f32.xlu2 %v744_v34 }
 0x2c4   :  { %v2126_v19 = vpop.xlane.xlu2 %304 }
 0x2c9   :  { %742 = vmax.xlane.f32.xlu2 %v741_v37 }
 0x2cc   :  { %v2130_v38 = vpop.xlane.xlu2 %307 }
 0x2d4   :  { %v2132_v39 = vpop.xlane.xlu2 %310 }
 0x2d5   :  { %v380_v15 = vand.u32 2147483648, %v2132_v39 }
 0x2dc   :  { %v2134_v22 = vpop.xlane.xlu2 %313 }
 0x2dd   :  { %vm389_vm14 = vweird.f32 %v2134_v22 }
 0x2e4   :  { %v2136_v35 = vpop.xlane.xlu2 %316 }
 0x2e5   :  { %vm404_vm10 = vweird.f32 %v2136_v35 }
 0x2ec   :  { %v320_v23 = vpop.xlane.xlu2 %319 }
 0x2ed   :  { %1809 = vrcp.f32 %v320_v23  ;;  %vm419_vm4 = vweird.f32 %v320_v23  ;;  %v425_v11 = vand.u32 2147483648, %v320_v23  ;;  %v423_v21 = vand.u32 2147483647, %v320_v23 }
 0x2ee   :  { %1811 = vrcp.f32 %v2136_v35 }
 0x2ef   :  { %1813 = vrcp.f32 %v2134_v22  ;;  %vm424_vm11 = vcmp.eq.f32.partialorder %v423_v21, 8.507059e+37 }
 0x2f0   :  { %1815 = vrcp.f32 %v2132_v39 }
 0x2f3   :  { %v1810_v29 = vpop.eup %1809 }
 0x2f4   :  { %v2140_v41 = vpop.eup %1811  ;;  %v415_v42 = vmul.f32 %v1810_v29, %v320_v23  ;;  %v323_v43 = vpop.xlane.xlu2 %322  ;;  %vm420_vm2 = vweird.f32 %v1810_v29  ;;  %v410_v23 = vand.u32 2147483648, %v2136_v35 }
 0x2f5   :  { %1817 = vrcp.f32 %v323_v43  ;;  %v400_v45 = vmul.f32 %v2140_v41, %v2136_v35  ;;  %v2145_v3 = vpop.eup %1813  ;;  %v440_v4 = vand.u32 2147483648, %v323_v43  ;;  %v438_v6 = vand.u32 2147483647, %v323_v43  ;;  %vm2162_vm6 = vmor %vm419_vm4, %vm420_vm2 }
 0x2f6   :  { %1819 = vrcp.f32 %v2130_v38  ;;  %v416_v46 = vsub.f32 1.0, %v415_v42  ;;  %v2148_v47 = vpop.eup %1815  ;;  %v385_v51 = vmul.f32 %v2145_v3, %v2134_v22  ;;  %vm434_vm5 = vweird.f32 %v323_v43 }
 0x2f7   :  { %v401_v54 = vsub.f32 1.0, %v400_v45  ;;  %1821 = vrcp.f32 %v2126_v19  ;;  %v370_v60 = vmul.f32 %v2148_v47, %v2132_v39  ;;  %v441_v30 = vor.u32 1.1754944e-38, %v440_v4 }
 0x2f8   :  { %v417_v55 = vmul.f32 %v1810_v29, %v416_v46  ;;  %v386_v0 = vsub.f32 1.0, %v385_v51  ;;  %vm405_vm8 = vweird.f32 %v2140_v41  ;;  %vm439_vm9 = vcmp.eq.f32.partialorder %v438_v6, 8.507059e+37 }
 0x2f9   :  { %v402_v1 = vmul.f32 %v2140_v41, %v401_v54  ;;  %v371_v49 = vsub.f32 1.0, %v370_v60  ;;  %v426_v45 = vor.u32 1.1754944e-38, %v425_v11  ;;  %vm2183_vm12 = vmor %vm404_vm10, %vm405_vm8  ;;  %vm390_vm13 = vweird.f32 %v2145_v3 }
 0x2fa   :  { %v418_v8 = vadd.f32 %v1810_v29, %v417_v55  ;;  %v387_v25 = vmul.f32 %v2145_v3, %v386_v0  ;;  %v408_v55 = vand.u32 2147483647, %v2136_v35  ;;  %v411_v4 = vor.u32 1.1754944e-38, %v410_v23  ;;  %vm2201_vm0 = vmor %vm389_vm14, %vm390_vm13 }
 0x2fb   :  { %v1818_v48 = vpop.eup %1817  ;;  %v393_v6 = vand.u32 2147483647, %v2134_v22  ;;  %vm375_vm2 = vweird.f32 %v2148_v47 }
 0x2fc   :  { %v430_v56 = vmul.f32 %v1818_v48, %v323_v43  ;;  %v2152_v57 = vpop.xlane.xlu2 %301  ;;  %v2154_v59 = vpop.eup %1819  ;;  %vm435_vm3 = vweird.f32 %v1818_v48  ;;  %v422_v42 = vsel %vm2162_vm6, %v1810_v29, %v418_v8  ;;  %v403_v43 = vadd.f32 %v2140_v41, %v402_v1 }
 0x2fd   :  { %v355_v9 = vmul.f32 %v2154_v59, %v2130_v38  ;;  %1823 = vrcp.f32 %v2152_v57  ;;  %vm436_vm7 = vmor %vm434_vm5, %vm435_vm3  ;;  %v2169_v32 = vpop.eup %1821  ;;  %v427_v60 = vsel %vm424_vm11, %v426_v45, %v422_v42  ;;  %v388_v35 = vadd.f32 %v2145_v3, %v387_v25 }
 0x2fe   :  { %v431_v63 = vsub.f32 1.0, %v430_v56  ;;  %v395_v1 = vand.u32 2147483648, %v2134_v22  ;;  %vm409_vm15 = vcmp.eq.f32.partialorder %v408_v55, 8.507059e+37  ;;  %vm374_vm3 = vweird.f32 %v2132_v39 }
 0x2ff   :  { %v356_v56 = vsub.f32 1.0, %v355_v9  ;;  %vm394_vm4 = vcmp.eq.f32.partialorder %v393_v6, 8.507059e+37  ;;  %vm2221_vm5 = vmor %vm374_vm3, %vm375_vm2  ;;  %vm360_vm6 = vweird.f32 %v2154_v59  ;;  %v363_v55 = vand.u32 2147483647, %v2130_v38 }
 0x300   :  { %v432_v5 = vmul.f32 %v1818_v48, %v431_v63  ;;  %v396_v21 = vor.u32 1.1754944e-38, %v395_v1  ;;  %vm345_vm10 = vweird.f32 %v2169_v32  ;;  %vm344_vm11 = vweird.f32 %v2126_v19 }
 0x301   :  { %vm346_vm13 = vmor %vm344_vm11, %vm345_vm10 }
 0x302   :  { %v433_v13 = vadd.f32 %v1818_v48, %v432_v5  ;;  %v428_v5 = vmul.f32 %v2081_v2, %v427_v60  ;;  %v392_v2 = vsel %vm2201_vm0, %v2145_v3, %v388_v35  ;;  %v348_v35 = vand.u32 2147483647, %v2126_v19 }
 0x303   :  { %v2194_v0 = vpop.eup %1823 }
 0x304   :  { %v764_v34 = vpop.xlane.xlu2 %763  ;;  %v437_v37 = vsel %vm436_vm7, %v1818_v48, %v433_v13  ;;  %v340_v48 = vmul.f32 %v2169_v32, %v2126_v19  ;;  %vm359_vm7 = vweird.f32 %v2130_v38  ;;  %vm330_vm14 = vweird.f32 %v2194_v0 }
 0x305   :  { %v772_v46 = vsub.f32 %v2094_v12, %v764_v34  ;;  %v442_v51 = vsel %vm439_vm9, %v441_v30, %v437_v37  ;;  %v372_v12 = vmul.f32 %v2148_v47, %v371_v49  ;;  %v325_v49 = vmul.f32 %v2194_v0, %v2152_v57  ;;  %vm2239_vm9 = vmor %vm359_vm7, %vm360_vm6 }
 0x306   :  { %v443_v54 = vmul.f32 %v2086_v7, %v442_v51  ;;  %v407_v7 = vsel %vm2183_vm12, %v2140_v41, %v403_v43  ;;  %v341_v8 = vsub.f32 1.0, %v340_v48  ;;  %v357_v41 = vmul.f32 %v2154_v59, %v356_v56 }
 0x307   :  { %v787_v29 = vmul.f32 1.442695, %v772_v46  ;;  %v412_v9 = vsel %vm409_vm15, %v411_v4, %v407_v7  ;;  %v373_v22 = vadd.f32 %v2148_v47, %v372_v12  ;;  %v378_v34 = vand.u32 2147483647, %v2132_v39 }
 0x308   :  { %1741 = vmatpush.xpose.msk.msra.mxu1 %vm251_vm1, %v443_v54  ;;  %v413_v30 = vmul.f32 %v2077_v58, %v412_v9  ;;  %v342_v3 = vmul.f32 %v2169_v32, %v341_v8  ;;  %v397_v43 = vsel %vm394_vm4, %v396_v21, %v392_v2  ;;  %v358_v45 = vadd.f32 %v2154_v59, %v357_v41 }
 0x309   :  { %1825 = vpow2.f32 %v787_v29  ;;  %v377_v39 = vsel %vm2221_vm5, %v2148_v47, %v373_v22  ;;  %v365_v46 = vand.u32 2147483648, %v2130_v38  ;;  %v381_v51 = vor.u32 1.1754944e-38, %v380_v15 }
 0x30a   :  { %v398_v54 = vmul.f32 %v2073_v50, %v397_v43  ;;  %vm379_vm8 = vcmp.eq.f32.partialorder %v378_v34, 8.507059e+37  ;;  %v362_v60 = vsel %vm2239_vm9, %v2154_v59, %v358_v45  ;;  %v343_v50 = vadd.f32 %v2169_v32, %v342_v3 }
 0x30b   :  { %v382_v48 = vsel %vm379_vm8, %v381_v51, %v377_v39  ;;  %v350_v38 = vand.u32 2147483648, %v2126_v19  ;;  %v366_v63 = vor.u32 1.1754944e-38, %v365_v46  ;;  %vm364_vm12 = vcmp.eq.f32.partialorder %v363_v55, 8.507059e+37 }
 0x30c   :  { %1742 = vmatpush.xpose.msk.msra.mxu1 %vm251_vm1, %v428_v5  ;;  %v761_v13 = vpop.xlane.xlu2 %760  ;;  %v383_v7 = vmul.f32 %v2069_v44, %v382_v48  ;;  %v347_v6 = vsel %vm346_vm13, %v2169_v32, %v343_v50  ;;  %v335_v8 = vand.u32 2147483648, %v2152_v57  ;;  %vm329_vm15 = vweird.f32 %v2152_v57 }
 0x30d   :  { %v771_v25 = vsub.f32 %v2098_v14, %v761_v13  ;;  %v326_v14 = vsub.f32 1.0, %v325_v49  ;;  %v367_v59 = vsel %vm364_vm12, %v366_v63, %v362_v60  ;;  %v351_v44 = vor.u32 1.1754944e-38, %v350_v38  ;;  %vm331_vm2 = vmor %vm329_vm15, %vm330_vm14 }
 0x30e   :  { %v368_v19 = vmul.f32 %v2065_v27, %v367_v59  ;;  %vm349_vm0 = vcmp.eq.f32.partialorder %v348_v35, 8.507059e+37  ;;  %v333_v41 = vand.u32 2147483647, %v2152_v57  ;;  %v336_v49 = vor.u32 1.1754944e-38, %v335_v8 }
 0x30f   :  { %v2218_v37 = vpop.eup %1825  ;;  %v785_v42 = vmul.f32 1.442695, %v771_v25  ;;  %v327_v47 = vmul.f32 %v2194_v0, %v326_v14  ;;  %v352_v9 = vsel %vm349_vm0, %v351_v44, %v347_v6 }
 0x310   :  { %1743 = vmatpush.xpose.msk.msra.mxu1 %vm251_vm1, %v413_v30  ;;  %v810_v58 = vsel %vm251_vm1, %v2218_v37, 0.0  ;;  %v353_v2 = vmul.f32 %v2061_v20, %v352_v9  ;;  %vm334_vm3 = vcmp.eq.f32.partialorder %v333_v41, 8.507059e+37 }
 0x311   :  { %1827 = vpow2.f32 %v785_v42  ;;  %811 = vadd.xlane.f32.xlu0 %v810_v58 }
 0x314   :  { %1744 = vmatpush.xpose.msk.msra.mxu1 %vm251_vm1, %v398_v54  ;;  %v758_v29 = vpop.xlane.xlu2 %757 }
 0x315   :  { %v770_v12 = vsub.f32 %v2102_v16, %v758_v29  ;;  %v328_v16 = vadd.f32 %v2194_v0, %v327_v47 }
 0x317   :  { %v2255_v1 = vpop.eup %1827  ;;  %v783_v4 = vmul.f32 1.442695, %v770_v12  ;;  %v332_v11 = vsel %vm331_vm2, %v2194_v0, %v328_v16 }
 0x318   :  { %1745 = vmatpush.xpose.msk.msra.mxu1 %vm251_vm1, %v383_v7  ;;  %v807_v5 = vsel %vm251_vm1, %v2255_v1, 0.0  ;;  %v337_v27 = vsel %vm334_vm3, %v336_v49, %v332_v11 }
 0x319   :  { %1829 = vpow2.f32 %v783_v4  ;;  %808 = vadd.xlane.f32.xlu1 %v807_v5  ;;  %v338_v21 = vmul.f32 %v2090_v10, %v337_v27 }
 0x31c   :  { %1746 = vmatpush.xpose.msk.msra.mxu1 %vm251_vm1, %v368_v19  ;;  %v755_v32 = vpop.xlane.xlu2 %754 }
 0x31d   :  { %v769_v13 = vsub.f32 %v2106_v24, %v755_v32 }
 0x31f   :  { %v2271_v22 = vpop.eup %1829  ;;  %v781_v15 = vmul.f32 1.442695, %v769_v13 }
 0x320   :  { %1747 = vmatpush.xpose.msk.msra.mxu1 %vm251_vm1, %v353_v2  ;;  %v804_v57 = vsel %vm251_vm1, %v2271_v22, 0.0 }
 0x321   :  { %1831 = vpow2.f32 %v781_v15  ;;  %805 = vadd.xlane.f32.xlu2 %v804_v57 }
 0x324   :  { %1748 = vmatpush.xpose.msk.msra.mxu1 %vm251_vm1, %v338_v21  ;;  %v752_v0 = vpop.xlane.xlu2 %751 }
 0x325   :  { %v768_v24 = vsub.f32 %v2110_v28, %v752_v0 }
 0x327   :  { %v2279_v20 = vpop.eup %1831  ;;  %v779_v25 = vmul.f32 1.442695, %v768_v24  ;;  %1749 = vmatmul.msk.f32.vlgmr.msra.gmra.mxu1 %vm251_vm1, %v1986_v53 }
 0x328   :  { %v801_v30 = vsel %vm251_vm1, %v2279_v20, 0.0 }
 0x329   :  { %1833 = vpow2.f32 %v779_v25  ;;  %802 = vadd.xlane.f32.xlu0 %v801_v30 }
 0x32c   :  { %v749_v34 = vpop.xlane.xlu2 %748 }
 0x32d   :  { %v767_v3 = vsub.f32 %v2114_v31, %v749_v34 }
 0x32f   :  { %v2286_v10 = vpop.eup %1833  ;;  %v777_v42 = vmul.f32 1.442695, %v767_v3  ;;  %1750 = vmatmul.msk.f32.gmra.mxu1 %vm251_vm1, %v1992_v61 }
 0x330   :  { %v798_v28 = vsel %vm251_vm1, %v2286_v10, 0.0 }
 0x331   :  { %1835 = vpow2.f32 %v777_v42  ;;  %799 = vadd.xlane.f32.xlu1 %v798_v28 }
 0x334   :  { %v746_v53 = vpop.xlane.xlu2 %745 }
 0x335   :  { %v766_v43 = vsub.f32 %v2119_v33, %v746_v53 }
 0x337   :  { %v2293_v23 = vpop.eup %1835  ;;  %v775_v14 = vmul.f32 1.442695, %v766_v43  ;;  %1751 = vmatmul.msk.f32.gmra.mxu1 %vm251_vm1, %v2008_v17 }
 0x338   :  { %v795_v31 = vsel %vm251_vm1, %v2293_v23, 0.0 }
 0x339   :  { %1837 = vpow2.f32 %v775_v14  ;;  %796 = vadd.xlane.f32.xlu2 %v795_v31 }
 0x33c   :  { %v743_v61 = vpop.xlane.xlu2 %742 }
 0x33d   :  { %v765_v58 = vsub.f32 %v2124_v36, %v743_v61 }
 0x33f   :  { %v2300_v39 = vpop.eup %1837  ;;  %v773_v45 = vmul.f32 1.442695, %v765_v58  ;;  %1752 = vmatmul.msk.f32.gmra.mxu1 %vm251_vm1, %v2025_v26 }
 0x340   :  { %v792_v33 = vsel %vm251_vm1, %v2300_v39, 0.0 }
 0x341   :  { %1839 = vpow2.f32 %v773_v45  ;;  %793 = vadd.xlane.f32.xlu0 %v792_v33 }
 0x347   :  { %v2306_v17 = vpop.eup %1839 }
 0x348   :  { %v789_v46 = vsel %vm251_vm1, %v2306_v17, 0.0 }
 0x349   :  { %790 = vadd.xlane.f32.xlu1 %v789_v46 }
 0x384   :  { %v812_v51 = vpop.xlane.xlu0 %811 }
 0x385   :  { %1841 = vrcp.f32 %v812_v51  ;;  %v929_v56 = vand.u32 2147483648, %v812_v51  ;;  %v927_v47 = vand.u32 2147483647, %v812_v51  ;;  %vm923_vm5 = vweird.f32 %v812_v51 }
 0x387   :  { %v930_v50 = vor.u32 1.1754944e-38, %v929_v56  ;;  %vm928_vm7 = vcmp.eq.f32.partialorder %v927_v47, 8.507059e+37 }
 0x38b   :  { %v1842_v36 = vpop.eup %1841 }
 0x38c   :  { %v919_v54 = vmul.f32 %v1842_v36, %v812_v51  ;;  %v809_v55 = vpop.xlane.xlu1 %808  ;;  %vm924_vm4 = vweird.f32 %v1842_v36 }
 0x38d   :  { %1843 = vrcp.f32 %v809_v55  ;;  %vm925_vm6 = vmor %vm923_vm5, %vm924_vm4  ;;  %v914_v59 = vand.u32 2147483648, %v809_v55  ;;  %v912_v6 = vand.u32 2147483647, %v809_v55  ;;  %vm908_vm9 = vweird.f32 %v809_v55 }
 0x38e   :  { %v920_v48 = vsub.f32 1.0, %v919_v54 }
 0x38f   :  { %v915_v8 = vor.u32 1.1754944e-38, %v914_v59  ;;  %vm913_vm11 = vcmp.eq.f32.partialorder %v912_v6, 8.507059e+37 }
 0x390   :  { %v921_v26 = vmul.f32 %v1842_v36, %v920_v48 }
 0x392   :  { %v922_v29 = vadd.f32 %v1842_v36, %v921_v26 }
 0x393   :  { %v1844_v60 = vpop.eup %1843 }
 0x394   :  { %v904_v38 = vmul.f32 %v1844_v60, %v809_v55  ;;  %v806_v63 = vpop.xlane.xlu2 %805  ;;  %v926_v12 = vsel %vm925_vm6, %v1842_v36, %v922_v29  ;;  %vm909_vm8 = vweird.f32 %v1844_v60 }
 0x395   :  { %1845 = vrcp.f32 %v806_v63  ;;  %v931_v7 = vsel %vm928_vm7, %v930_v50, %v926_v12  ;;  %vm910_vm10 = vmor %vm908_vm9, %vm909_vm8  ;;  %v899_v13 = vand.u32 2147483648, %v806_v63  ;;  %v897_v2 = vand.u32 2147483647, %v806_v63 }
 0x396   :  { %v905_v35 = vsub.f32 1.0, %v904_v38  ;;  %v932_v4 = vmul.f32 %v2218_v37, %v931_v7  ;;  %vm893_vm13 = vweird.f32 %v806_v63 }
 0x397   :  { %v900_v57 = vor.u32 1.1754944e-38, %v899_v13  ;;  %vm898_vm15 = vcmp.eq.f32.partialorder %v897_v2, 8.507059e+37 }
 0x398   :  { %v906_v5 = vmul.f32 %v1844_v60, %v905_v35  ;;  %1761 = vmatpush.xpose.msk.msra.mxu3 %vm251_vm1, %v932_v4 }
 0x39a   :  { %v907_v16 = vadd.f32 %v1844_v60, %v906_v5 }
 0x39b   :  { %v1846_v44 = vpop.eup %1845 }
 0x39c   :  { %v889_v19 = vmul.f32 %v1846_v44, %v806_v63  ;;  %v803_v41 = vpop.xlane.xlu0 %802  ;;  %v911_v9 = vsel %vm910_vm10, %v1844_v60, %v907_v16  ;;  %vm894_vm12 = vweird.f32 %v1846_v44 }
 0x39d   :  { %1847 = vrcp.f32 %v803_v41  ;;  %v916_v32 = vsel %vm913_vm11, %v915_v8, %v911_v9  ;;  %vm895_vm14 = vmor %vm893_vm13, %vm894_vm12  ;;  %v884_v28 = vand.u32 2147483648, %v803_v41  ;;  %v882_v53 = vand.u32 2147483647, %v803_v41 }
 0x39e   :  { %v890_v11 = vsub.f32 1.0, %v889_v19  ;;  %v917_v37 = vmul.f32 %v2255_v1, %v916_v32  ;;  %vm878_vm2 = vweird.f32 %v803_v41 }
 0x39f   :  { %v885_v31 = vor.u32 1.1754944e-38, %v884_v28  ;;  %vm883_vm4 = vcmp.eq.f32.partialorder %v882_v53, 8.507059e+37 }
 0x3a0   :  { %v891_v49 = vmul.f32 %v1846_v44, %v890_v11  ;;  %1762 = vmatpush.xpose.msk.msra.mxu3 %vm251_vm1, %v917_v37 }
 0x3a2   :  { %v892_v15 = vadd.f32 %v1846_v44, %v891_v49 }
 0x3a3   :  { %v1848_v27 = vpop.eup %1847 }
 0x3a4   :  { %v874_v21 = vmul.f32 %v1848_v27, %v803_v41  ;;  %v2314_v0 = vpop.f32.mrf.mxu1  ;;  %v800_v24 = vpop.xlane.xlu1 %799  ;;  %v896_v25 = vsel %vm895_vm14, %v1846_v44, %v892_v15  ;;  %vm879_vm0 = vweird.f32 %v1848_v27 }
 0x3a5   :  { %v510_v30 = vrot.slane %v2314_v0, 1  ;;  %1849 = vrcp.f32 %v800_v24  ;;  %v901_v34 = vsel %vm898_vm15, %v900_v57, %v896_v25  ;;  %vm880_vm3 = vmor %vm878_vm2, %vm879_vm0  ;;  %v869_v55 = vand.u32 2147483648, %v800_v24 }
 0x3a6   :  { %v875_v1 = vsub.f32 1.0, %v874_v21  ;;  %v902_v3 = vmul.f32 %v2271_v22, %v901_v34  ;;  %v867_v48 = vand.u32 2147483647, %v800_v24  ;;  %vm863_vm6 = vweird.f32 %v800_v24 }
 0x3a7   :  { %511 = vrot.lane.b32.xlu2 %v510_v30, %s1886_s3  ;;  %v870_v47 = vor.u32 1.1754944e-38, %v869_v55 }
 0x3a8   :  { %v876_v42 = vmul.f32 %v1848_v27, %v875_v1  ;;  %1763 = vmatpush.xpose.msk.msra.mxu3 %vm251_vm1, %v902_v3  ;;  %vm868_vm8 = vcmp.eq.f32.partialorder %v867_v48, 8.507059e+37 }
 0x3aa   :  { %v877_v43 = vadd.f32 %v1848_v27, %v876_v42 }
 0x3ab   :  { %v1850_v14 = vpop.eup %1849 }
 0x3ac   :  { %v859_v61 = vmul.f32 %v1850_v14, %v800_v24  ;;  %v2320_v58 = vpop.f32.mrf.mxu1  ;;  %v797_v45 = vpop.xlane.xlu2 %796  ;;  %v881_v33 = vsel %vm880_vm3, %v1848_v27, %v877_v43  ;;  %vm864_vm5 = vweird.f32 %v1850_v14 }
 0x3ad   :  { %v533_v46 = vrot.slane %v2320_v58, 1  ;;  %1851 = vrcp.f32 %v797_v45  ;;  %v886_v51 = vsel %vm883_vm4, %v885_v31, %v881_v33  ;;  %vm865_vm7 = vmor %vm863_vm6, %vm864_vm5  ;;  %v854_v4 = vand.u32 2147483648, %v797_v45 }
 0x3ae   :  { %v860_v22 = vsub.f32 1.0, %v859_v61  ;;  %v887_v36 = vmul.f32 %v2279_v20, %v886_v51  ;;  %v852_v59 = vand.u32 2147483647, %v797_v45  ;;  %vm848_vm10 = vweird.f32 %v797_v45 }
 0x3af   :  { %534 = vrot.lane.b32.xlu0 %v533_v46, %s1886_s3  ;;  %v855_v16 = vor.u32 1.1754944e-38, %v854_v4  ;;  %v1125_v4 = vld [vmem:[%s3170_s4 + $0xf8] sm:$0xff] }
 0x3b0   :  { %v861_v54 = vmul.f32 %v1850_v14, %v860_v22  ;;  %1764 = vmatpush.xpose.msk.msra.mxu3 %vm251_vm1, %v887_v36  ;;  %vm853_vm12 = vcmp.eq.f32.partialorder %v852_v59, 8.507059e+37  ;;  %v1141_v59 = vld [vmem:[%s3170_s4 + $0x178] sm:$0xff] }
 0x3b1   :  { %1435 = vmatpush.msrb.mxu0 %v1141_v59  ;;  %v1111_v59 = vld [vmem:[%s3170_s4 + $0x88] sm:$0xff] }
 0x3b2   :  { %v862_v56 = vadd.f32 %v1850_v14, %v861_v54 }
 0x3b3   :  { %v1852_v26 = vpop.eup %1851 }
 0x3b4   :  { %v844_v29 = vmul.f32 %v1852_v26, %v797_v45  ;;  %v2326_v60 = vpop.f32.mrf.mxu1  ;;  %v794_v50 = vpop.xlane.xlu0 %793  ;;  %v866_v38 = vsel %vm865_vm7, %v1850_v14, %v862_v56  ;;  %vm849_vm9 = vweird.f32 %v1852_v26 }
 0x3b5   :  { %v556_v63 = vrot.slane %v2326_v60, 1  ;;  %1853 = vrcp.f32 %v794_v50  ;;  %v871_v12 = vsel %vm868_vm8, %v870_v47, %v866_v38  ;;  %vm850_vm11 = vmor %vm848_vm10, %vm849_vm9  ;;  %v839_v11 = vand.u32 2147483648, %v794_v50 }
 0x3b6   :  { %v845_v20 = vsub.f32 1.0, %v844_v29  ;;  %v872_v7 = vmul.f32 %v2286_v10, %v871_v12  ;;  %v837_v13 = vand.u32 2147483647, %v794_v50  ;;  %vm833_vm14 = vweird.f32 %v794_v50 }
 0x3b7   :  { %557 = vrot.lane.b32.xlu1 %v556_v63, %s1886_s3  ;;  %v840_v27 = vor.u32 1.1754944e-38, %v839_v11  ;;  %v1106_v11 = vld [vmem:[%s3170_s4 + $0x60] sm:$0xff] }
 0x3b8   :  { %v846_v35 = vmul.f32 %v1852_v26, %v845_v20  ;;  %1765 = vmatpush.xpose.msk.msra.mxu3 %vm251_vm1, %v872_v7  ;;  %vm838_vm0 = vcmp.eq.f32.partialorder %v837_v13, 8.507059e+37  ;;  %v1154_v13 = vld [vmem:[%s3170_s4 + $0x1e0] sm:$0xff] }
 0x3ba   :  { %v847_v5 = vadd.f32 %v1852_v26, %v846_v35  ;;  %v1109_v35 = vld [vmem:[%s3170_s4 + $0x78] sm:$0xff] }
 0x3bb   :  { %v1854_v6 = vpop.eup %1853  ;;  %1395 = vmatpush.msrb.mxu1 %v1109_v35  ;;  %v1144_v35 = vld [vmem:[%s3170_s4 + $0x190] sm:$0xff] }
 0x3bc   :  { %v829_v44 = vmul.f32 %v1854_v6, %v794_v50  ;;  %v2332_v8 = vpop.f32.mrf.mxu1  ;;  %v791_v19 = vpop.xlane.xlu1 %790  ;;  %v851_v41 = vsel %vm850_vm11, %v1852_v26, %v847_v5  ;;  %vm834_vm13 = vweird.f32 %v1854_v6  ;;  %v1157_v5 = vld [vmem:[%s3170_s4 + $0x1f8] sm:$0xff] }
 0x3bd   :  { %v579_v9 = vrot.slane %v2332_v8, 1  ;;  %1855 = vrcp.f32 %v791_v19  ;;  %v856_v32 = vsel %vm853_vm12, %v855_v16, %v851_v41  ;;  %vm835_vm15 = vmor %vm833_vm14, %vm834_vm13  ;;  %v824_v1 = vand.u32 2147483648, %v791_v19  ;;  %1455 = vmatpush.msrb.mxu2 %v1157_v5  ;;  %v1108_v16 = vld [vmem:[%s3170_s4 + $0x70] sm:$0xff]  ;;  %v1107_v41 = vld [vmem:[%s3170_s4 + $0x68] sm:$0xff] }
 0x3be   :  { %v830_v10 = vsub.f32 1.0, %v829_v44  ;;  %v857_v37 = vmul.f32 %v2293_v23, %v856_v32  ;;  %v822_v23 = vand.u32 2147483647, %v791_v19  ;;  %vm818_vm3 = vweird.f32 %v791_v19  ;;  %v1124_v44 = vld [vmem:[%s3170_s4 + $0xf0] sm:$0xff]  ;;  %1396 = vmatpush.msrb.mxu1 %v1108_v16  ;;  %v1155_v32 = vld [vmem:[%s3170_s4 + $0x1e8] sm:$0xff]  ;;  %v1094_v16 = vld [vmem:[%s3170_s4] sm:$0xff] }
 0x3bf   :  { %580 = vrot.lane.b32.xlu0 %v579_v9, %s1886_s3  ;;  %v825_v42 = vor.u32 1.1754944e-38, %v824_v1  ;;  %v1123_v9 = vld [vmem:[%s3170_s4 + $0xe8] sm:$0xff]  ;;  %v1120_v1 = vld [vmem:[%s3170_s4 + $0xd0] sm:$0xff] }
 0x3c0   :  { %v831_v49 = vmul.f32 %v1854_v6, %v830_v10  ;;  %1766 = vmatpush.xpose.msk.msra.mxu3 %vm251_vm1, %v857_v37  ;;  %vm823_vm5 = vcmp.eq.f32.partialorder %v822_v23, 8.507059e+37  ;;  %v1139_v10 = vld [vmem:[%s3170_s4 + $0x168] sm:$0xff]  ;;  %1397 = vmatpush.msrb.mxu1 %v1107_v41  ;;  %v1122_v37 = vld [vmem:[%s3170_s4 + $0xe0] sm:$0xff]  ;;  %v1152_v23 = vld [vmem:[%s3170_s4 + $0x1d0] sm:$0xff] }
 0x3c1   :  { %v1127_v5 = vld [vmem:[%s3170_s4 + $0x108] sm:$0xff]  ;;  %v1173_v41 = vld [vmem:[%s3170_s4 + $0x278] sm:$0xff] }
 0x3c2   :  { %v832_v2 = vadd.f32 %v1854_v6, %v831_v49  ;;  %v1138_v49 = vld [vmem:[%s3170_s4 + $0x160] sm:$0xff]  ;;  %1398 = vmatpush.msrb.mxu1 %v1106_v11  ;;  %v1172_v11 = vld [vmem:[%s3170_s4 + $0x270] sm:$0xff] }
 0x3c3   :  { %v1856_v15 = vpop.eup %1855 }
 0x3c4   :  { %v814_v57 = vmul.f32 %v1856_v15, %v791_v19  ;;  %v836_v21 = vsel %vm835_vm15, %v1854_v6, %v832_v2  ;;  %vm819_vm2 = vweird.f32 %v1856_v15  ;;  %v1156_v19 = vld [vmem:[%s3170_s4 + $0x1f0] sm:$0xff] }
 0x3c5   :  { %v841_v24 = vsel %vm838_vm0, %v840_v27, %v836_v21  ;;  %vm820_vm4 = vmor %vm818_vm3, %vm819_vm2  ;;  %1456 = vmatpush.msrb.mxu2 %v1156_v19  ;;  %v1121_v27 = vld [vmem:[%s3170_s4 + $0xd8] sm:$0xff]  ;;  %v1142_v19 = vld [vmem:[%s3170_s4 + $0x180] sm:$0xff] }
 0x3c6   :  { %v815_v25 = vsub.f32 1.0, %v814_v57  ;;  %v842_v30 = vmul.f32 %v2300_v39, %v841_v24  ;;  %v1137_v57 = vld [vmem:[%s3170_s4 + $0x158] sm:$0xff] }
 0x3c7   :  { %1457 = vmatpush.msrb.mxu2 %v1155_v32  ;;  %v1153_v24 = vld [vmem:[%s3170_s4 + $0x1d8] sm:$0xff] }
 0x3c8   :  { %v816_v34 = vmul.f32 %v1856_v15, %v815_v25  ;;  %1767 = vmatpush.xpose.msk.msra.mxu3 %vm251_vm1, %v842_v30  ;;  %v1104_v30 = vld [vmem:[%s3170_s4 + $0x50] sm:$0xff]  ;;  %v1221_v32 = vld [vmem:[%s3170_s4 + $0x3f8] sm:$0xff] }
 0x3c9   :  { %1458 = vmatpush.msrb.mxu2 %v1154_v13 }
 0x3ca   :  { %v817_v3 = vadd.f32 %v1856_v15, %v816_v34  ;;  %v1136_v34 = vld [vmem:[%s3170_s4 + $0x150] sm:$0xff] }
 0x3cb   :  { %1459 = vmatpush.msrb.mxu2 %v1153_v24  ;;  %v1219_v24 = vld [vmem:[%s3170_s4 + $0x3e8] sm:$0xff] }
 0x3cc   :  { %v821_v28 = vsel %vm820_vm4, %v1856_v15, %v817_v3  ;;  %v1105_v15 = vld [vmem:[%s3170_s4 + $0x58] sm:$0xff]  ;;  %v1103_v3 = vld [vmem:[%s3170_s4 + $0x48] sm:$0xff] }
 0x3cd   :  { %v826_v53 = vsel %vm823_vm5, %v825_v42, %v821_v28  ;;  %1399 = vmatpush.msrb.mxu1 %v1105_v15  ;;  %1460 = vmatpush.msrb.mxu2 %v1152_v23  ;;  %v1119_v42 = vld [vmem:[%s3170_s4 + $0xc8] sm:$0xff]  ;;  %v1169_v23 = vld [vmem:[%s3170_s4 + $0x258] sm:$0xff] }
 0x3ce   :  { %v827_v43 = vmul.f32 %v2306_v17, %v826_v53  ;;  %v1135_v28 = vld [vmem:[%s3170_s4 + $0x148] sm:$0xff] }
 0x3cf   :  { %1400 = vmatpush.msrb.mxu1 %v1104_v30  ;;  %v1151_v53 = vld [vmem:[%s3170_s4 + $0x1c8] sm:$0xff]  ;;  %v1186_v30 = vld [vmem:[%s3170_s4 + $0x2e0] sm:$0xff] }
 0x3d0   :  { %1768 = vmatpush.xpose.msk.msra.mxu3 %vm251_vm1, %v827_v43  ;;  %1461 = vmatpush.msrb.mxu2 %v1151_v53  ;;  %v1102_v43 = vld [vmem:[%s3170_s4 + $0x40] sm:$0xff]  ;;  %v1171_v15 = vld [vmem:[%s3170_s4 + $0x268] sm:$0xff]  ;;  %v1168_v53 = vld [vmem:[%s3170_s4 + $0x250] sm:$0xff] }
 0x3d1   :  { %1401 = vmatpush.msrb.mxu1 %v1103_v3  ;;  %v1185_v3 = vld [vmem:[%s3170_s4 + $0x2d8] sm:$0xff] }
 0x3d3   :  { %1769 = vmatmul.msk.f32.vlgmr.msra.gmra.mxu3 %vm251_vm1, %v1984_v52  ;;  %1402 = vmatpush.msrb.mxu1 %v1102_v43  ;;  %v1184_v43 = vld [vmem:[%s3170_s4 + $0x2d0] sm:$0xff] }
 0x3d4   :  { %1415 = vmatpush.msrb.mxu3 %v1125_v4  ;;  %v1095_v4 = vld [vmem:[%s3170_s4 + $0x8] sm:$0xff] }
 0x3d6   :  { %1416 = vmatpush.msrb.mxu3 %v1124_v44  ;;  %v1110_v44 = vld [vmem:[%s3170_s4 + $0x80] sm:$0xff] }
 0x3d8   :  { %1417 = vmatpush.msrb.mxu3 %v1123_v9  ;;  %v1189_v9 = vld [vmem:[%s3170_s4 + $0x2f8] sm:$0xff] }
 0x3da   :  { %1418 = vmatpush.msrb.mxu3 %v1122_v37  ;;  %v1188_v37 = vld [vmem:[%s3170_s4 + $0x2f0] sm:$0xff] }
 0x3db   :  { %1770 = vmatmul.msk.f32.gmra.mxu3 %vm251_vm1, %v1994_v62 }
 0x3dc   :  { %1419 = vmatpush.msrb.mxu3 %v1121_v27  ;;  %v1187_v27 = vld [vmem:[%s3170_s4 + $0x2e8] sm:$0xff] }
 0x3de   :  { %1420 = vmatpush.msrb.mxu3 %v1120_v1  ;;  %v1202_v1 = vld [vmem:[%s3170_s4 + $0x360] sm:$0xff] }
 0x3e0   :  { %1421 = vmatpush.msrb.mxu3 %v1119_v42  ;;  %v1201_v42 = vld [vmem:[%s3170_s4 + $0x358] sm:$0xff] }
 0x3e3   :  { %1771 = vmatmul.msk.f32.gmra.mxu3 %vm251_vm1, %v2010_v18 }
 0x3eb   :  { %1772 = vmatmul.msk.f32.gmra.mxu3 %vm251_vm1, %v2023_v40 }
 0x401   :  { %v512_v39 = vpop.permute.xlu2 %511 }
 0x402   :  { %v514_v14 = vsel %vm251_vm1, %v2314_v0, %v512_v39  ;;  %v1118_v39 = vld [vmem:[%s3170_s4 + $0xc0] sm:$0xff] }
 0x403   :  { %515 = vst [vmem:[#allocation2] sm:$0x1] %v514_v14  ;;  %1422 = vmatpush.msrb.mxu3 %v1118_v39  ;;  %v1200_v39 = vld [vmem:[%s3170_s4 + $0x350] sm:$0xff] }
 0x404   :  { %517 = vst.sshfl [vmem:[#allocation1] sm:$0xff pattern:$0x73625140] %v514_v14 }
 0x40b   :  { %v519_v17 = vld [vmem:[#allocation1 + $0x1] ss:$4 sm:$0xff] }
 0x40c   :  { %522 = vst.sshfl [vmem:[#allocation1] sm:$0xff pattern:$0x73625140] %v514_v14 }
 0x40d   :  { %521 = vst [vmem:[#allocation2 + $0x2] sm:$0x1] %v519_v17  ;;  %v1150_v17 = vld [vmem:[%s3170_s4 + $0x1c0] sm:$0xff] }
 0x40e   :  { %1462 = vmatpush.msrb.mxu2 %v1150_v17 }
 0x413   :  { %v524_v31 = vld [vmem:[#allocation1 + $0x2] ss:$4 sm:$0xff] }
 0x414   :  { %527 = vst.sshfl [vmem:[#allocation1] sm:$0xff pattern:$0x73625140] %v514_v14  ;;  %v1134_v14 = vld [vmem:[%s3170_s4 + $0x140] sm:$0xff] }
 0x415   :  { %526 = vst [vmem:[#allocation2 + $0x4] sm:$0x1] %v524_v31 }
 0x41b   :  { %v529_v52 = vld [vmem:[#allocation1 + $0x3] ss:$4 sm:$0xff] }
 0x41c   :  { %531 = vst [vmem:[#allocation2 + $0x6] sm:$0x1] %v529_v52  ;;  %v1101_v52 = vld [vmem:[%s3170_s4 + $0x38] sm:$0xff] }
 0x41d   :  { %1403 = vmatpush.msrb.mxu1 %v1101_v52  ;;  %v1183_v52 = vld [vmem:[%s3170_s4 + $0x2c8] sm:$0xff] }
 0x421   :  { %v535_v62 = vpop.permute.xlu0 %534 }
 0x422   :  { %v537_v18 = vsel %vm251_vm1, %v2320_v58, %v535_v62  ;;  %v1117_v62 = vld [vmem:[%s3170_s4 + $0xb8] sm:$0xff] }
 0x423   :  { %538 = vst [vmem:[#allocation2 + $0x8] sm:$0x1] %v537_v18  ;;  %1423 = vmatpush.msrb.mxu3 %v1117_v62  ;;  %v1199_v62 = vld [vmem:[%s3170_s4 + $0x348] sm:$0xff] }
 0x424   :  { %540 = vst.sshfl [vmem:[#allocation1] sm:$0xff pattern:$0x73625140] %v537_v18 }
 0x429   :  { %v558_v40 = vpop.permute.xlu1 %557 }
 0x42a   :  { %v560_v0 = vsel %vm251_vm1, %v2326_v60, %v558_v40 }
 0x42b   :  { %v542_v61 = vld [vmem:[#allocation1 + $0x1] ss:$4 sm:$0xff]  ;;  %561 = vst [vmem:[#allocation2 + $0x10] sm:$0x1] %v560_v0 }
 0x42c   :  { %545 = vst.sshfl [vmem:[#allocation1] sm:$0xff pattern:$0x73625140] %v537_v18 }
 0x42d   :  { %544 = vst [vmem:[#allocation2 + $0xa] sm:$0x1] %v542_v61  ;;  %v1100_v61 = vld [vmem:[%s3170_s4 + $0x30] sm:$0xff] }
 0x42e   :  { %1404 = vmatpush.msrb.mxu1 %v1100_v61  ;;  %v1198_v61 = vld [vmem:[%s3170_s4 + $0x340] sm:$0xff] }
 0x431   :  { %v581_v45 = vpop.permute.xlu0 %580 }
 0x432   :  { %v583_v33 = vsel %vm251_vm1, %v2332_v8, %v581_v45  ;;  %v1140_v8 = vld [vmem:[%s3170_s4 + $0x170] sm:$0xff] }
 0x433   :  { %v547_v46 = vld [vmem:[#allocation1 + $0x2] ss:$4 sm:$0xff]  ;;  %584 = vst [vmem:[#allocation2 + $0x18] sm:$0x1] %v583_v33  ;;  %1436 = vmatpush.msrb.mxu0 %v1140_v8 }
 0x434   :  { %550 = vst.sshfl [vmem:[#allocation1] sm:$0xff pattern:$0x73625140] %v537_v18  ;;  %v1133_v18 = vld [vmem:[%s3170_s4 + $0x138] sm:$0xff]  ;;  %v1116_v45 = vld [vmem:[%s3170_s4 + $0xb0] sm:$0xff]  ;;  %v1126_v8 = vld [vmem:[%s3170_s4 + $0x100] sm:$0xff] }
 0x435   :  { %549 = vst [vmem:[#allocation2 + $0xc] sm:$0x1] %v547_v46  ;;  %1437 = vmatpush.msrb.mxu0 %v1139_v10  ;;  %1424 = vmatpush.msrb.mxu3 %v1116_v45  ;;  %v1148_v46 = vld [vmem:[%s3170_s4 + $0x1b0] sm:$0xff]  ;;  %v1205_v10 = vld [vmem:[%s3170_s4 + $0x378] sm:$0xff]  ;;  %v1214_v45 = vld [vmem:[%s3170_s4 + $0x3c0] sm:$0xff] }
 0x437   :  { %1438 = vmatpush.msrb.mxu0 %v1138_v49  ;;  %v1204_v49 = vld [vmem:[%s3170_s4 + $0x370] sm:$0xff] }
 0x439   :  { %1439 = vmatpush.msrb.mxu0 %v1137_v57  ;;  %v1203_v57 = vld [vmem:[%s3170_s4 + $0x368] sm:$0xff] }
 0x43b   :  { %v552_v22 = vld [vmem:[#allocation1 + $0x3] ss:$4 sm:$0xff]  ;;  %1440 = vmatpush.msrb.mxu0 %v1136_v34 }
 0x43c   :  { %554 = vst [vmem:[#allocation2 + $0xe] sm:$0x1] %v552_v22  ;;  %v1099_v22 = vld [vmem:[%s3170_s4 + $0x28] sm:$0xff]  ;;  %v1218_v34 = vld [vmem:[%s3170_s4 + $0x3e0] sm:$0xff] }
 0x43d   :  { %563 = vst.sshfl [vmem:[#allocation1] sm:$0xff pattern:$0x73625140] %v560_v0  ;;  %1441 = vmatpush.msrb.mxu0 %v1135_v28  ;;  %1405 = vmatpush.msrb.mxu1 %v1099_v22  ;;  %v1217_v28 = vld [vmem:[%s3170_s4 + $0x3d8] sm:$0xff] }
 0x43e   :  { %v1197_v22 = vld [vmem:[%s3170_s4 + $0x338] sm:$0xff] }
 0x43f   :  { %1442 = vmatpush.msrb.mxu0 %v1134_v14  ;;  %v1216_v14 = vld [vmem:[%s3170_s4 + $0x3d0] sm:$0xff] }
 0x441   :  { %1443 = vmatpush.msrb.mxu0 %v1133_v18  ;;  %v1215_v18 = vld [vmem:[%s3170_s4 + $0x3c8] sm:$0xff] }
 0x444   :  { %v565_v58 = vld [vmem:[#allocation1 + $0x1] ss:$4 sm:$0xff] }
 0x445   :  { %568 = vst.sshfl [vmem:[#allocation1] sm:$0xff pattern:$0x73625140] %v560_v0 }
 0x446   :  { %567 = vst [vmem:[#allocation2 + $0x12] sm:$0x1] %v565_v58  ;;  %v1115_v58 = vld [vmem:[%s3170_s4 + $0xa8] sm:$0xff] }
 0x447   :  { %1425 = vmatpush.msrb.mxu3 %v1115_v58  ;;  %v1213_v58 = vld [vmem:[%s3170_s4 + $0x3b8] sm:$0xff] }
 0x44c   :  { %v570_v51 = vld [vmem:[#allocation1 + $0x2] ss:$4 sm:$0xff] }
 0x44d   :  { %573 = vst.sshfl [vmem:[#allocation1] sm:$0xff pattern:$0x73625140] %v560_v0  ;;  %v1149_v0 = vld [vmem:[%s3170_s4 + $0x1b8] sm:$0xff] }
 0x44e   :  { %572 = vst [vmem:[#allocation2 + $0x14] sm:$0x1] %v570_v51  ;;  %1463 = vmatpush.msrb.mxu2 %v1149_v0  ;;  %v1131_v51 = vld [vmem:[%s3170_s4 + $0x128] sm:$0xff]  ;;  %v1182_v0 = vld [vmem:[%s3170_s4 + $0x2c0] sm:$0xff] }
 0x450   :  { %1464 = vmatpush.msrb.mxu2 %v1148_v46  ;;  %v1181_v46 = vld [vmem:[%s3170_s4 + $0x2b8] sm:$0xff] }
 0x454   :  { %v575_v36 = vld [vmem:[#allocation1 + $0x3] ss:$4 sm:$0xff] }
 0x455   :  { %577 = vst [vmem:[#allocation2 + $0x16] sm:$0x1] %v575_v36  ;;  %v1147_v36 = vld [vmem:[%s3170_s4 + $0x1a8] sm:$0xff] }
 0x456   :  { %586 = vst.sshfl [vmem:[#allocation1] sm:$0xff pattern:$0x73625140] %v583_v33  ;;  %v986_v54 = vpop.f32.mrf.mxu3  ;;  %1465 = vmatpush.msrb.mxu2 %v1147_v36  ;;  %v1180_v36 = vld [vmem:[%s3170_s4 + $0x2b0] sm:$0xff] }
 0x457   :  { %v999_v55 = vrot.slane %v986_v54, 1 }
 0x459   :  { %1000 = vrot.lane.b32.xlu2 %v999_v55, %s1886_s3  ;;  %v1114_v55 = vld [vmem:[%s3170_s4 + $0xa0] sm:$0xff] }
 0x45a   :  { %1426 = vmatpush.msrb.mxu3 %v1114_v55  ;;  %v1212_v55 = vld [vmem:[%s3170_s4 + $0x3b0] sm:$0xff] }
 0x45d   :  { %v588_v48 = vld [vmem:[#allocation1 + $0x1] ss:$4 sm:$0xff] }
 0x45e   :  { %591 = vst.sshfl [vmem:[#allocation1] sm:$0xff pattern:$0x73625140] %v583_v33  ;;  %v2359_v56 = vpop.f32.mrf.mxu3 }
 0x45f   :  { %590 = vst [vmem:[#allocation2 + $0x1a] sm:$0x1] %v588_v48  ;;  %v1022_v26 = vrot.slane %v2359_v56, 1  ;;  %v1130_v48 = vld [vmem:[%s3170_s4 + $0x120] sm:$0xff] }
 0x461   :  { %1023 = vrot.lane.b32.xlu1 %v1022_v26, %s1886_s3 }
 0x465   :  { %v593_v47 = vld [vmem:[#allocation1 + $0x2] ss:$4 sm:$0xff] }
 0x466   :  { %596 = vst.sshfl [vmem:[#allocation1] sm:$0xff pattern:$0x73625140] %v583_v33  ;;  %v2363_v29 = vpop.f32.mrf.mxu3  ;;  %v1132_v33 = vld [vmem:[%s3170_s4 + $0x130] sm:$0xff] }
 0x467   :  { %595 = vst [vmem:[#allocation2 + $0x1c] sm:$0x1] %v593_v47  ;;  %v1045_v60 = vrot.slane %v2363_v29, 1  ;;  %1444 = vmatpush.msrb.mxu0 %v1132_v33  ;;  %v1097_v47 = vld [vmem:[%s3170_s4 + $0x18] sm:$0xff] }
 0x468   :  { %v1165_v33 = vld [vmem:[%s3170_s4 + $0x238] sm:$0xff] }
 0x469   :  { %1046 = vrot.lane.b32.xlu0 %v1045_v60, %s1886_s3  ;;  %1445 = vmatpush.msrb.mxu0 %v1131_v51  ;;  %v1113_v60 = vld [vmem:[%s3170_s4 + $0x98] sm:$0xff]  ;;  %v1164_v51 = vld [vmem:[%s3170_s4 + $0x230] sm:$0xff] }
 0x46a   :  { %1427 = vmatpush.msrb.mxu3 %v1113_v60  ;;  %v1211_v60 = vld [vmem:[%s3170_s4 + $0x3a8] sm:$0xff] }
 0x46b   :  { %1446 = vmatpush.msrb.mxu0 %v1130_v48  ;;  %v1163_v48 = vld [vmem:[%s3170_s4 + $0x228] sm:$0xff] }
 0x46d   :  { %v598_v50 = vld [vmem:[#allocation1 + $0x3] ss:$4 sm:$0xff] }
 0x46e   :  { %600 = vst [vmem:[#allocation2 + $0x1e] sm:$0x1] %v598_v50  ;;  %v995_v38 = vpop.f32.mrf.mxu3  ;;  %v1129_v50 = vld [vmem:[%s3170_s4 + $0x118] sm:$0xff] }
 0x46f   :  { %v1068_v63 = vrot.slane %v995_v38, 1  ;;  %1447 = vmatpush.msrb.mxu0 %v1129_v50  ;;  %v1162_v50 = vld [vmem:[%s3170_s4 + $0x220] sm:$0xff] }
 0x471   :  { %1069 = vrot.lane.b32.xlu2 %v1068_v63, %s1886_s3  ;;  %v1145_v63 = vld [vmem:[%s3170_s4 + $0x198] sm:$0xff] }
 0x4b3   :  { %v1001_v20 = vpop.permute.xlu2 %1000 }
 0x4b4   :  { %v1003_v12 = vsel %vm251_vm1, %v986_v54, %v1001_v20  ;;  %v1098_v54 = vld [vmem:[%s3170_s4 + $0x20] sm:$0xff] }
 0x4b5   :  { %1004 = vst [vmem:[#allocation2 + $0x1] sm:$0x1] %v1003_v12  ;;  %1406 = vmatpush.msrb.mxu1 %v1098_v54  ;;  %v1196_v54 = vld [vmem:[%s3170_s4 + $0x330] sm:$0xff] }
 0x4b6   :  { %1006 = vst.sshfl [vmem:[#allocation1] sm:$0xff pattern:$0x73625140] %v1003_v12 }
 0x4b7   :  { %1407 = vmatpush.msrb.mxu1 %v1097_v47  ;;  %v1195_v47 = vld [vmem:[%s3170_s4 + $0x328] sm:$0xff] }
 0x4bd   :  { %v1008_v7 = vld [vmem:[#allocation1 + $0x1] ss:$4 sm:$0xff] }
 0x4be   :  { %1011 = vst.sshfl [vmem:[#allocation1] sm:$0xff pattern:$0x73625140] %v1003_v12 }
 0x4bf   :  { %1010 = vst [vmem:[#allocation2 + $0x3] sm:$0x1] %v1008_v7  ;;  %v1128_v7 = vld [vmem:[%s3170_s4 + $0x110] sm:$0xff] }
 0x4c0   :  { %1448 = vmatpush.msrb.mxu0 %v1128_v7  ;;  %v1177_v7 = vld [vmem:[%s3170_s4 + $0x298] sm:$0xff] }
 0x4c2   :  { %1449 = vmatpush.msrb.mxu0 %v1127_v5  ;;  %v1160_v5 = vld [vmem:[%s3170_s4 + $0x210] sm:$0xff] }
 0x4c4   :  { %1450 = vmatpush.msrb.mxu0 %v1126_v8  ;;  %v1159_v8 = vld [vmem:[%s3170_s4 + $0x208] sm:$0xff] }
 0x4c5   :  { %v1013_v6 = vld [vmem:[#allocation1 + $0x2] ss:$4 sm:$0xff] }
 0x4c6   :  { %1016 = vst.sshfl [vmem:[#allocation1] sm:$0xff pattern:$0x73625140] %v1003_v12  ;;  %v1096_v12 = vld [vmem:[%s3170_s4 + $0x10] sm:$0xff]  ;;  %1515 = vmatpush.msra.mxu0 %v1205_v10  ;;  %v1207_v10 = vld [vmem:[%s3170_s4 + $0x388] sm:$0xff] }
 0x4c7   :  { %1015 = vst [vmem:[#allocation2 + $0x5] sm:$0x1] %v1013_v6  ;;  %1408 = vmatpush.msrb.mxu1 %v1096_v12  ;;  %v1143_v6 = vld [vmem:[%s3170_s4 + $0x188] sm:$0xff]  ;;  %v1210_v12 = vld [vmem:[%s3170_s4 + $0x3a0] sm:$0xff] }
 0x4c8   :  { %1516 = vmatpush.msra.mxu0 %v1204_v49 }
 0x4c9   :  { %1409 = vmatpush.msrb.mxu1 %v1095_v4  ;;  %v1209_v4 = vld [vmem:[%s3170_s4 + $0x398] sm:$0xff] }
 0x4ca   :  { %1517 = vmatpush.msra.mxu0 %v1203_v57  ;;  %v1253_v57 = vld [vmem:[%s3170_s4 + $0x4f8] sm:$0xff] }
 0x4cb   :  { %v1070_v2 = vpop.permute.xlu2 %1069  ;;  %1410 = vmatpush.msrb.mxu1 %v1094_v16  ;;  %v1192_v16 = vld [vmem:[%s3170_s4 + $0x310] sm:$0xff] }
 0x4cc   :  { %v2427_v21 = vsel %vm251_vm1, %v995_v38, %v1070_v2  ;;  %v1220_v2 = vld [vmem:[%s3170_s4 + $0x3f0] sm:$0xff]  ;;  %1518 = vmatpush.msra.mxu0 %v1202_v1 }
 0x4cd   :  { %v1018_v25 = vld [vmem:[#allocation1 + $0x3] ss:$4 sm:$0xff]  ;;  %1073 = vst [vmem:[#allocation2 + $0x19] sm:$0x1] %v2427_v21  ;;  %1475 = vmatpush.msra.mxu1 %v1173_v41 }
 0x4ce   :  { %1020 = vst [vmem:[#allocation2 + $0x7] sm:$0x1] %v1018_v25  ;;  %v1170_v25 = vld [vmem:[%s3170_s4 + $0x260] sm:$0xff]  ;;  %1519 = vmatpush.msra.mxu0 %v1201_v42  ;;  %v1236_v42 = vld [vmem:[%s3170_s4 + $0x470] sm:$0xff] }
 0x4cf   :  { %1476 = vmatpush.msra.mxu1 %v1172_v11  ;;  %v1174_v11 = vld [vmem:[%s3170_s4 + $0x280] sm:$0xff] }
 0x4d0   :  { %1520 = vmatpush.msra.mxu0 %v1200_v39  ;;  %v1235_v39 = vld [vmem:[%s3170_s4 + $0x468] sm:$0xff] }
 0x4d1   :  { %1477 = vmatpush.msra.mxu1 %v1171_v15 }
 0x4d2   :  { %1521 = vmatpush.msra.mxu0 %v1199_v62  ;;  %v1250_v62 = vld [vmem:[%s3170_s4 + $0x4e0] sm:$0xff] }
 0x4d3   :  { %v1024_v31 = vpop.permute.xlu1 %1023  ;;  %1478 = vmatpush.msra.mxu1 %v1170_v25  ;;  %v1269_v25 = vld [vmem:[%s3170_s4 + $0x578] sm:$0xff] }
 0x4d4   :  { %v2480_v40 = vsel %vm251_vm1, %v2359_v56, %v1024_v31  ;;  %v1146_v56 = vld [vmem:[%s3170_s4 + $0x1a0] sm:$0xff]  ;;  %v1167_v31 = vld [vmem:[%s3170_s4 + $0x248] sm:$0xff]  ;;  %1522 = vmatpush.msra.mxu0 %v1198_v61 }
 0x4d5   :  { %1027 = vst [vmem:[#allocation2 + $0x9] sm:$0x1] %v2480_v40  ;;  %1466 = vmatpush.msrb.mxu2 %v1146_v56  ;;  %1479 = vmatpush.msra.mxu1 %v1169_v23  ;;  %v1179_v56 = vld [vmem:[%s3170_s4 + $0x2a8] sm:$0xff] }
 0x4d6   :  { %1029 = vst.sshfl [vmem:[#allocation1] sm:$0xff pattern:$0x73625140] %v2480_v40  ;;  %1523 = vmatpush.msra.mxu0 %v1197_v22  ;;  %v1090_v15 = vld [vmem:[#allocation2] sm:$0xff]  ;;  %v1233_v22 = vld [vmem:[%s3170_s4 + $0x458] sm:$0xff] }
 0x4d7   :  { %1467 = vmatpush.msrb.mxu2 %v1145_v63  ;;  %1480 = vmatpush.msra.mxu1 %v1168_v53  ;;  %v1178_v63 = vld [vmem:[%s3170_s4 + $0x2a0] sm:$0xff]  ;;  %v1268_v53 = vld [vmem:[%s3170_s4 + $0x570] sm:$0xff] }
 0x4d8   :  { %1524 = vmatpush.msra.mxu0 %v1196_v54  ;;  %v1232_v54 = vld [vmem:[%s3170_s4 + $0x450] sm:$0xff] }
 0x4d9   :  { %1468 = vmatpush.msrb.mxu2 %v1144_v35  ;;  %1481 = vmatpush.msra.mxu1 %v1167_v31  ;;  %v1193_v35 = vld [vmem:[%s3170_s4 + $0x318] sm:$0xff]  ;;  %v1283_v31 = vld [vmem:[%s3170_s4 + $0x5e8] sm:$0xff] }
 0x4da   :  { %1525 = vmatpush.msra.mxu0 %v1195_v47  ;;  %v1247_v47 = vld [vmem:[%s3170_s4 + $0x4c8] sm:$0xff] }
 0x4db   :  { %v1047_v26 = vpop.permute.xlu0 %1046  ;;  %1469 = vmatpush.msrb.mxu2 %v1143_v6  ;;  %v1176_v6 = vld [vmem:[%s3170_s4 + $0x290] sm:$0xff] }
 0x4dc   :  { %v2534_v38 = vsel %vm251_vm1, %v2363_v29, %v1047_v26  ;;  %v1112_v29 = vld [vmem:[%s3170_s4 + $0x90] sm:$0xff]  ;;  %vm1715_vm1 = vcmask 74752  }
 0x4dd   :  { %v1031_v20 = vld [vmem:[#allocation1 + $0x1] ss:$4 sm:$0xff]  ;;  %1050 = vst [vmem:[#allocation2 + $0x11] sm:$0x1] %v2534_v38  ;;  %1428 = vmatpush.msrb.mxu3 %v1112_v29  ;;  %1470 = vmatpush.msrb.mxu2 %v1142_v19 }
 0x4de   :  { %1034 = vst.sshfl [vmem:[#allocation1] sm:$0xff pattern:$0x73625140] %v2480_v40  ;;  %v1161_v29 = vld [vmem:[%s3170_s4 + $0x218] sm:$0xff]  ;;  %v1175_v19 = vld [vmem:[%s3170_s4 + $0x288] sm:$0xff] }
 0x4df   :  { %1033 = vst [vmem:[#allocation2 + $0xb] sm:$0x1] %v1031_v20  ;;  %1429 = vmatpush.msrb.mxu3 %v1111_v59  ;;  %1535 = vmatpush.msra.mxu2 %v1221_v32  ;;  %v1194_v20 = vld [vmem:[%s3170_s4 + $0x320] sm:$0xff] }
 0x4e0   :  { %1526 = vmatpush.msra.mxu0 %v1194_v20  ;;  %v1158_v32 = vld [vmem:[%s3170_s4 + $0x200] sm:$0xff] }
 0x4e1   :  { %1430 = vmatpush.msrb.mxu3 %v1110_v44  ;;  %1536 = vmatpush.msra.mxu2 %v1220_v2  ;;  %v1208_v44 = vld [vmem:[%s3170_s4 + $0x390] sm:$0xff]  ;;  %v1246_v20 = vld [vmem:[%s3170_s4 + $0x4c0] sm:$0xff] }
 0x4e2   :  { %1527 = vmatpush.msra.mxu0 %v1193_v35  ;;  %v1245_v35 = vld [vmem:[%s3170_s4 + $0x4b8] sm:$0xff] }
 0x4e3   :  { %1495 = vmatpush.msra.mxu3 %v1189_v9  ;;  %1537 = vmatpush.msra.mxu2 %v1219_v24  ;;  %v1191_v9 = vld [vmem:[%s3170_s4 + $0x308] sm:$0xff] }
 0x4e4   :  { %1528 = vmatpush.msra.mxu0 %v1192_v16  ;;  %v1260_v16 = vld [vmem:[%s3170_s4 + $0x530] sm:$0xff] }
 0x4e5   :  { %v1036_v13 = vld [vmem:[#allocation1 + $0x2] ss:$4 sm:$0xff]  ;;  %1496 = vmatpush.msra.mxu3 %v1188_v37  ;;  %1538 = vmatpush.msra.mxu2 %v1218_v34 }
 0x4e6   :  { %1039 = vst.sshfl [vmem:[#allocation1] sm:$0xff pattern:$0x73625140] %v2480_v40  ;;  %v1166_v40 = vld [vmem:[%s3170_s4 + $0x240] sm:$0xff]  ;;  %1529 = vmatpush.msra.mxu0 %v1191_v9  ;;  %v1275_v9 = vld [vmem:[%s3170_s4 + $0x5a8] sm:$0xff] }
 0x4e7   :  { %1038 = vst [vmem:[#allocation2 + $0xd] sm:$0x1] %v1036_v13  ;;  %1497 = vmatpush.msra.mxu3 %v1187_v27  ;;  %1539 = vmatpush.msra.mxu2 %v1217_v28  ;;  %v1190_v37 = vld [vmem:[%s3170_s4 + $0x300] sm:$0xff]  ;;  %v1237_v27 = vld [vmem:[%s3170_s4 + $0x478] sm:$0xff]  ;;  %v1252_v28 = vld [vmem:[%s3170_s4 + $0x4f0] sm:$0xff] }
 0x4e8   :  { %1482 = vmatpush.msra.mxu1 %v1166_v40  ;;  %1530 = vmatpush.msra.mxu0 %v1190_v37  ;;  %v1282_v40 = vld [vmem:[%s3170_s4 + $0x5e0] sm:$0xff] }
 0x4e9   :  { %1498 = vmatpush.msra.mxu3 %v1186_v30  ;;  %1540 = vmatpush.msra.mxu2 %v1216_v14  ;;  %v1251_v14 = vld [vmem:[%s3170_s4 + $0x4e8] sm:$0xff]  ;;  %v1274_v37 = vld [vmem:[%s3170_s4 + $0x5a0] sm:$0xff] }
 0x4ea   :  { %1483 = vmatpush.msra.mxu1 %v1165_v33 }
 0x4eb   :  { %1499 = vmatpush.msra.mxu3 %v1185_v3  ;;  %1541 = vmatpush.msra.mxu2 %v1215_v18  ;;  %v1266_v18 = vld [vmem:[%s3170_s4 + $0x560] sm:$0xff] }
 0x4ec   :  { %1484 = vmatpush.msra.mxu1 %v1164_v51  ;;  %v1265_v51 = vld [vmem:[%s3170_s4 + $0x558] sm:$0xff] }
 0x4ed   :  { %v1041_v17 = vld [vmem:[#allocation1 + $0x3] ss:$4 sm:$0xff]  ;;  %1500 = vmatpush.msra.mxu3 %v1184_v43  ;;  %1542 = vmatpush.msra.mxu2 %v1214_v45 }
 0x4ee   :  { %1043 = vst [vmem:[#allocation2 + $0xf] sm:$0x1] %v1041_v17  ;;  %1485 = vmatpush.msra.mxu1 %v1163_v48  ;;  %v1284_v43 = vld [vmem:[%s3170_s4 + $0x5f0] sm:$0xff]  ;;  %v1267_v17 = vld [vmem:[%s3170_s4 + $0x568] sm:$0xff] }
 0x4ef   :  { %1052 = vst.sshfl [vmem:[#allocation1] sm:$0xff pattern:$0x73625140] %v2534_v38  ;;  %1501 = vmatpush.msra.mxu3 %v1183_v52  ;;  %1543 = vmatpush.msra.mxu2 %v1213_v58  ;;  %v1234_v52 = vld [vmem:[%s3170_s4 + $0x460] sm:$0xff]  ;;  %v1249_v58 = vld [vmem:[%s3170_s4 + $0x4d8] sm:$0xff]  ;;  %v1264_v48 = vld [vmem:[%s3170_s4 + $0x550] sm:$0xff] }
 0x4f0   :  { %1486 = vmatpush.msra.mxu1 %v1162_v50  ;;  %v1279_v50 = vld [vmem:[%s3170_s4 + $0x5c8] sm:$0xff] }
 0x4f1   :  { %1502 = vmatpush.msra.mxu3 %v1182_v0  ;;  %1544 = vmatpush.msra.mxu2 %v1212_v55  ;;  %v1248_v55 = vld [vmem:[%s3170_s4 + $0x4d0] sm:$0xff] }
 0x4f2   :  { %1487 = vmatpush.msra.mxu1 %v1161_v29  ;;  %v1278_v29 = vld [vmem:[%s3170_s4 + $0x5c0] sm:$0xff] }
 0x4f3   :  { %1503 = vmatpush.msra.mxu3 %v1181_v46  ;;  %1545 = vmatpush.msra.mxu2 %v1211_v60  ;;  %v1263_v60 = vld [vmem:[%s3170_s4 + $0x548] sm:$0xff] }
 0x4f4   :  { %1488 = vmatpush.msra.mxu1 %v1160_v5  ;;  %v1228_v5 = vld [vmem:[%s3170_s4 + $0x430] sm:$0xff] }
 0x4f5   :  { %1504 = vmatpush.msra.mxu3 %v1180_v36  ;;  %v1091_v59 = vld [vmem:[#allocation2 + $0x8] sm:$0xff]  ;;  %1546 = vmatpush.msra.mxu2 %v1210_v12  ;;  %v1281_v36 = vld [vmem:[%s3170_s4 + $0x5d8] sm:$0xff]  ;;  %v1262_v12 = vld [vmem:[%s3170_s4 + $0x540] sm:$0xff] }
 0x4f6   :  { %v1054_v26 = vld [vmem:[#allocation1 + $0x1] ss:$4 sm:$0xff]  ;;  %1360 = vst [vmem:[#allocation1 + $0x20] ss:$4 sm:$0xff] %v1091_v59  ;;  %1489 = vmatpush.msra.mxu1 %v1159_v8 }
 0x4f7   :  { %1057 = vst.sshfl [vmem:[#allocation1] sm:$0xff pattern:$0x73625140] %v2534_v38  ;;  %1505 = vmatpush.msra.mxu3 %v1179_v56  ;;  %1547 = vmatpush.msra.mxu2 %v1209_v4  ;;  %v1280_v56 = vld [vmem:[%s3170_s4 + $0x5d0] sm:$0xff]  ;;  %v1261_v4 = vld [vmem:[%s3170_s4 + $0x538] sm:$0xff]  ;;  %v1227_v8 = vld [vmem:[%s3170_s4 + $0x428] sm:$0xff] }
 0x4f8   :  { %1056 = vst [vmem:[#allocation2 + $0x13] sm:$0x1] %v1054_v26  ;;  %1490 = vmatpush.msra.mxu1 %v1158_v32  ;;  %v1231_v26 = vld [vmem:[%s3170_s4 + $0x448] sm:$0xff]  ;;  %v1277_v59 = vld [vmem:[%s3170_s4 + $0x5b8] sm:$0xff]  ;;  %v1242_v32 = vld [vmem:[%s3170_s4 + $0x4a0] sm:$0xff] }
 0x4f9   :  { %1506 = vmatpush.msra.mxu3 %v1178_v63  ;;  %1548 = vmatpush.msra.mxu2 %v1208_v44  ;;  %v1230_v63 = vld [vmem:[%s3170_s4 + $0x440] sm:$0xff]  ;;  %v1276_v44 = vld [vmem:[%s3170_s4 + $0x5b0] sm:$0xff] }
 0x4fb   :  { %1507 = vmatpush.msra.mxu3 %v1177_v7  ;;  %1549 = vmatpush.msra.mxu2 %v1207_v10  ;;  %v1229_v7 = vld [vmem:[%s3170_s4 + $0x438] sm:$0xff]  ;;  %v1226_v10 = vld [vmem:[%s3170_s4 + $0x420] sm:$0xff] }
 0x4fd   :  { %1508 = vmatpush.msra.mxu3 %v1176_v6  ;;  %v1365_v0 = vld.sshfl [vmem:[#allocation1 + $0x20] sm:$0xff pattern:$0x73625140]  ;;  %v1366_v61 = vld.sshfl [vmem:[#allocation1 + $0x28] sm:$0xff pattern:$0x73625140] }
 0x4fe   :  { %v1059_v41 = vld [vmem:[#allocation1 + $0x2] ss:$4 sm:$0xff] }
 0x4ff   :  { %1062 = vst.sshfl [vmem:[#allocation1] sm:$0xff pattern:$0x73625140] %v2534_v38  ;;  %1509 = vmatpush.msra.mxu3 %v1175_v19  ;;  %v1206_v38 = vld [vmem:[%s3170_s4 + $0x380] sm:$0xff]  ;;  %v1244_v6 = vld [vmem:[%s3170_s4 + $0x4b0] sm:$0xff]  ;;  %v1243_v19 = vld [vmem:[%s3170_s4 + $0x4a8] sm:$0xff] }
 0x500   :  { %1061 = vst [vmem:[#allocation2 + $0x15] sm:$0x1] %v1059_v41  ;;  %1550 = vmatpush.msra.mxu2 %v1206_v38  ;;  %v1367_v45 = vld.sshfl [vmem:[#allocation1 + $0x30] sm:$0xff pattern:$0x73625140]  ;;  %v1259_v41 = vld [vmem:[%s3170_s4 + $0x528] sm:$0xff] }
 0x501   :  { %1510 = vmatpush.msra.mxu3 %v1174_v11  ;;  %v1368_v33 = vld.sshfl [vmem:[#allocation1 + $0x38] sm:$0xff pattern:$0x73625140]  ;;  %v1258_v11 = vld [vmem:[%s3170_s4 + $0x520] sm:$0xff] }
 0x502   :  { %v1225_v38 = vld [vmem:[%s3170_s4 + $0x418] sm:$0xff] }
 0x506   :  { %v1064_v49 = vld [vmem:[#allocation1 + $0x3] ss:$4 sm:$0xff] }
 0x507   :  { %1066 = vst [vmem:[#allocation2 + $0x17] sm:$0x1] %v1064_v49  ;;  %v1241_v49 = vld [vmem:[%s3170_s4 + $0x498] sm:$0xff] }
 0x508   :  { %1075 = vst.sshfl [vmem:[#allocation1] sm:$0xff pattern:$0x73625140] %v2427_v21 }
 0x50e   :  { %v1092_v24 = vld [vmem:[#allocation2 + $0x10] sm:$0xff] }
 0x50f   :  { %v1077_v13 = vld [vmem:[#allocation1 + $0x1] ss:$4 sm:$0xff] }
 0x510   :  { %1080 = vst.sshfl [vmem:[#allocation1] sm:$0xff pattern:$0x73625140] %v2427_v21 }
 0x511   :  { %1079 = vst [vmem:[#allocation2 + $0x1b] sm:$0x1] %v1077_v13  ;;  %v1257_v13 = vld [vmem:[%s3170_s4 + $0x518] sm:$0xff] }
 0x517   :  { %v1082_v2 = vld [vmem:[#allocation1 + $0x2] ss:$4 sm:$0xff] }
 0x518   :  { %1085 = vst.sshfl [vmem:[#allocation1] sm:$0xff pattern:$0x73625140] %v2427_v21  ;;  %v1285_v21 = vld [vmem:[%s3170_s4 + $0x5f8] sm:$0xff] }
 0x519   :  { %1358 = vst [vmem:[#allocation1] ss:$4 sm:$0xff] %v1090_v15  ;;  %v1224_v15 = vld [vmem:[%s3170_s4 + $0x410] sm:$0xff] }
 0x51a   :  { %1084 = vst [vmem:[#allocation2 + $0x1d] sm:$0x1] %v1082_v2  ;;  %v1273_v2 = vld [vmem:[%s3170_s4 + $0x598] sm:$0xff] }
 0x51f   :  { %v1087_v30 = vld [vmem:[#allocation1 + $0x3] ss:$4 sm:$0xff] }
 0x520   :  { %v1361_v1 = vld.sshfl [vmem:[#allocation1] sm:$0xff pattern:$0x73625140]  ;;  %v1362_v34 = vld.sshfl [vmem:[#allocation1 + $0x8] sm:$0xff pattern:$0x73625140] }
 0x521   :  { %1411 = vmatmul.f32.vlgmr.msrb.gmra.mxu1 %v1361_v1  ;;  %1431 = vmatmul.f32.vlgmr.msrb.gmra.mxu3 %v1362_v34  ;;  %v1363_v23 = vld.sshfl [vmem:[#allocation1 + $0x10] sm:$0xff pattern:$0x73625140]  ;;  %v1364_v3 = vld.sshfl [vmem:[#allocation1 + $0x18] sm:$0xff pattern:$0x73625140] }
 0x522   :  { %1451 = vmatmul.f32.vlgmr.msrb.gmra.mxu0 %v1363_v23  ;;  %1369 = vst [vmem:[#allocation1] ss:$4 sm:$0xff] %v1092_v24  ;;  %1471 = vmatmul.f32.vlgmr.msrb.gmra.mxu2 %v1364_v3  ;;  %v1272_v24 = vld [vmem:[%s3170_s4 + $0x590] sm:$0xff]  ;;  %v1271_v1 = vld [vmem:[%s3170_s4 + $0x588] sm:$0xff]  ;;  %v1222_v34 = vld [vmem:[%s3170_s4 + $0x400] sm:$0xff] }
 0x523   :  { %1555 = vmatpush.msrb.mxu1 %v1237_v27  ;;  %1575 = vmatpush.msrb.mxu3 %v1253_v57  ;;  %1089 = vst [vmem:[#allocation2 + $0x1f] sm:$0x1] %v1087_v30  ;;  %v1240_v27 = vld [vmem:[%s3170_s4 + $0x490] sm:$0xff]  ;;  %v1255_v30 = vld [vmem:[%s3170_s4 + $0x508] sm:$0xff]  ;;  %v1238_v23 = vld [vmem:[%s3170_s4 + $0x480] sm:$0xff] }
 0x524   :  { %1595 = vmatpush.msrb.mxu0 %v1269_v25  ;;  %1615 = vmatpush.msrb.mxu2 %v1285_v21  ;;  %v1256_v57 = vld [vmem:[%s3170_s4 + $0x510] sm:$0xff]  ;;  %v1223_v25 = vld [vmem:[%s3170_s4 + $0x408] sm:$0xff]  ;;  %v1254_v3 = vld [vmem:[%s3170_s4 + $0x500] sm:$0xff] }
 0x525   :  { %1556 = vmatpush.msrb.mxu1 %v1236_v42  ;;  %1576 = vmatpush.msrb.mxu3 %v1252_v28  ;;  %v1239_v21 = vld [vmem:[%s3170_s4 + $0x488] sm:$0xff]  ;;  %v1270_v42 = vld [vmem:[%s3170_s4 + $0x580] sm:$0xff]  ;;  %v1301_v28 = vld [vmem:[%s3170_s4 + $0x678] sm:$0xff] }
 0x526   :  { %1596 = vmatpush.msrb.mxu0 %v1268_v53  ;;  %1616 = vmatpush.msrb.mxu2 %v1284_v43  ;;  %v1317_v53 = vld [vmem:[%s3170_s4 + $0x6f8] sm:$0xff] }
 0x527   :  { %1557 = vmatpush.msrb.mxu1 %v1235_v39  ;;  %1577 = vmatpush.msrb.mxu3 %v1251_v14  ;;  %v1333_v43 = vld [vmem:[%s3170_s4 + $0x778] sm:$0xff] }
 0x528   :  { %1597 = vmatpush.msrb.mxu0 %v1267_v17  ;;  %1617 = vmatpush.msrb.mxu2 %v1283_v31  ;;  %v1349_v39 = vld [vmem:[%s3170_s4 + $0x7f8] sm:$0xff] }
 0x529   :  { %1558 = vmatpush.msrb.mxu1 %v1234_v52  ;;  %1578 = vmatpush.msrb.mxu3 %v1250_v62  ;;  %v1371_v14 = vld.sshfl [vmem:[#allocation1] sm:$0xff pattern:$0x73625140]  ;;  %v1372_v17 = vld.sshfl [vmem:[#allocation1 + $0x8] sm:$0xff pattern:$0x73625140] }
 0x52a   :  { %1598 = vmatpush.msrb.mxu0 %v1266_v18  ;;  %1618 = vmatpush.msrb.mxu2 %v1282_v40  ;;  %v1093_v46 = vld [vmem:[#allocation2 + $0x18] sm:$0xff]  ;;  %v1373_v31 = vld.sshfl [vmem:[#allocation1 + $0x10] sm:$0xff pattern:$0x73625140] }
 0x52b   :  { %1491 = vmatmul.f32.vlgmr.msra.gmra.mxu1 %v1365_v0  ;;  %1511 = vmatmul.f32.vlgmr.msra.gmra.mxu3 %v1366_v61  ;;  %1370 = vst [vmem:[#allocation1 + $0x20] ss:$4 sm:$0xff] %v1093_v46  ;;  %v1374_v52 = vld.sshfl [vmem:[#allocation1 + $0x18] sm:$0xff pattern:$0x73625140]  ;;  %v1300_v62 = vld [vmem:[%s3170_s4 + $0x670] sm:$0xff] }
 0x52c   :  { %1531 = vmatmul.f32.vlgmr.msra.gmra.mxu0 %v1367_v45  ;;  %1551 = vmatmul.f32.vlgmr.msra.gmra.mxu2 %v1368_v33  ;;  %v1316_v18 = vld [vmem:[%s3170_s4 + $0x6f0] sm:$0xff]  ;;  %v1299_v61 = vld [vmem:[%s3170_s4 + $0x668] sm:$0xff] }
 0x52d   :  { %1559 = vmatpush.msrb.mxu1 %v1233_v22  ;;  %1579 = vmatpush.msrb.mxu3 %v1249_v58  ;;  %v1332_v40 = vld [vmem:[%s3170_s4 + $0x770] sm:$0xff]  ;;  %v1315_v45 = vld [vmem:[%s3170_s4 + $0x6e8] sm:$0xff]  ;;  %v1298_v22 = vld [vmem:[%s3170_s4 + $0x660] sm:$0xff] }
 0x52e   :  { %1599 = vmatpush.msrb.mxu0 %v1265_v51  ;;  %1619 = vmatpush.msrb.mxu2 %v1281_v36  ;;  %v1348_v0 = vld [vmem:[%s3170_s4 + $0x7f0] sm:$0xff]  ;;  %v1331_v33 = vld [vmem:[%s3170_s4 + $0x768] sm:$0xff]  ;;  %v1314_v58 = vld [vmem:[%s3170_s4 + $0x6e0] sm:$0xff] }
 0x52f   :  { %1560 = vmatpush.msrb.mxu1 %v1232_v54  ;;  %1580 = vmatpush.msrb.mxu3 %v1248_v55  ;;  %v1347_v46 = vld [vmem:[%s3170_s4 + $0x7e8] sm:$0xff]  ;;  %v1330_v51 = vld [vmem:[%s3170_s4 + $0x760] sm:$0xff]  ;;  %v1297_v54 = vld [vmem:[%s3170_s4 + $0x658] sm:$0xff] }
 0x530   :  { %1600 = vmatpush.msrb.mxu0 %v1264_v48  ;;  %1620 = vmatpush.msrb.mxu2 %v1280_v56  ;;  %v1346_v36 = vld [vmem:[%s3170_s4 + $0x7e0] sm:$0xff]  ;;  %v1313_v55 = vld [vmem:[%s3170_s4 + $0x6d8] sm:$0xff] }
 0x531   :  { %1561 = vmatpush.msrb.mxu1 %v1231_v26  ;;  %1581 = vmatpush.msrb.mxu3 %v1247_v47  ;;  %v1329_v48 = vld [vmem:[%s3170_s4 + $0x758] sm:$0xff]  ;;  %v1296_v26 = vld [vmem:[%s3170_s4 + $0x650] sm:$0xff] }
 0x532   :  { %1601 = vmatpush.msrb.mxu0 %v1263_v60  ;;  %1621 = vmatpush.msrb.mxu2 %v1279_v50  ;;  %v1345_v56 = vld [vmem:[%s3170_s4 + $0x7d8] sm:$0xff]  ;;  %v1312_v47 = vld [vmem:[%s3170_s4 + $0x6d0] sm:$0xff] }
 0x533   :  { %1562 = vmatpush.msrb.mxu1 %v1230_v63  ;;  %1582 = vmatpush.msrb.mxu3 %v1246_v20  ;;  %v1328_v60 = vld [vmem:[%s3170_s4 + $0x750] sm:$0xff]  ;;  %v1295_v63 = vld [vmem:[%s3170_s4 + $0x648] sm:$0xff] }
 0x534   :  { %1602 = vmatpush.msrb.mxu0 %v1262_v12  ;;  %1622 = vmatpush.msrb.mxu2 %v1278_v29  ;;  %v1344_v50 = vld [vmem:[%s3170_s4 + $0x7d0] sm:$0xff]  ;;  %v1311_v20 = vld [vmem:[%s3170_s4 + $0x6c8] sm:$0xff] }
 0x535   :  { %1563 = vmatpush.msrb.mxu1 %v1229_v7  ;;  %1583 = vmatpush.msrb.mxu3 %v1245_v35  ;;  %v1327_v12 = vld [vmem:[%s3170_s4 + $0x748] sm:$0xff]  ;;  %v1294_v7 = vld [vmem:[%s3170_s4 + $0x640] sm:$0xff] }
 0x536   :  { %1603 = vmatpush.msrb.mxu0 %v1261_v4  ;;  %1623 = vmatpush.msrb.mxu2 %v1277_v59  ;;  %v1343_v29 = vld [vmem:[%s3170_s4 + $0x7c8] sm:$0xff]  ;;  %v1310_v35 = vld [vmem:[%s3170_s4 + $0x6c0] sm:$0xff] }
 0x537   :  { %1564 = vmatpush.msrb.mxu1 %v1228_v5  ;;  %1584 = vmatpush.msrb.mxu3 %v1244_v6  ;;  %v1326_v4 = vld [vmem:[%s3170_s4 + $0x740] sm:$0xff]  ;;  %v1293_v5 = vld [vmem:[%s3170_s4 + $0x638] sm:$0xff] }
 0x538   :  { %1604 = vmatpush.msrb.mxu0 %v1260_v16  ;;  %1624 = vmatpush.msrb.mxu2 %v1276_v44  ;;  %v1342_v59 = vld [vmem:[%s3170_s4 + $0x7c0] sm:$0xff]  ;;  %v1309_v6 = vld [vmem:[%s3170_s4 + $0x6b8] sm:$0xff] }
 0x539   :  { %1565 = vmatpush.msrb.mxu1 %v1227_v8  ;;  %1585 = vmatpush.msrb.mxu3 %v1243_v19  ;;  %v1325_v16 = vld [vmem:[%s3170_s4 + $0x738] sm:$0xff]  ;;  %v1292_v8 = vld [vmem:[%s3170_s4 + $0x630] sm:$0xff] }
 0x53a   :  { %1605 = vmatpush.msrb.mxu0 %v1259_v41  ;;  %1625 = vmatpush.msrb.mxu2 %v1275_v9  ;;  %v1341_v44 = vld [vmem:[%s3170_s4 + $0x7b8] sm:$0xff]  ;;  %v1308_v19 = vld [vmem:[%s3170_s4 + $0x6b0] sm:$0xff] }
 0x53b   :  { %1566 = vmatpush.msrb.mxu1 %v1226_v10  ;;  %1586 = vmatpush.msrb.mxu3 %v1242_v32  ;;  %v1324_v41 = vld [vmem:[%s3170_s4 + $0x730] sm:$0xff]  ;;  %v1291_v10 = vld [vmem:[%s3170_s4 + $0x628] sm:$0xff] }
 0x53c   :  { %1606 = vmatpush.msrb.mxu0 %v1258_v11  ;;  %1626 = vmatpush.msrb.mxu2 %v1274_v37  ;;  %v1340_v9 = vld [vmem:[%s3170_s4 + $0x7b0] sm:$0xff]  ;;  %v1307_v32 = vld [vmem:[%s3170_s4 + $0x6a8] sm:$0xff] }
 0x53d   :  { %1567 = vmatpush.msrb.mxu1 %v1225_v38  ;;  %1587 = vmatpush.msrb.mxu3 %v1241_v49  ;;  %v1323_v11 = vld [vmem:[%s3170_s4 + $0x728] sm:$0xff]  ;;  %v1290_v38 = vld [vmem:[%s3170_s4 + $0x620] sm:$0xff] }
 0x53e   :  { %1607 = vmatpush.msrb.mxu0 %v1257_v13  ;;  %1627 = vmatpush.msrb.mxu2 %v1273_v2  ;;  %v1339_v37 = vld [vmem:[%s3170_s4 + $0x7a8] sm:$0xff]  ;;  %v1306_v49 = vld [vmem:[%s3170_s4 + $0x6a0] sm:$0xff] }
 0x53f   :  { %1568 = vmatpush.msrb.mxu1 %v1224_v15  ;;  %1588 = vmatpush.msrb.mxu3 %v1240_v27  ;;  %v1322_v13 = vld [vmem:[%s3170_s4 + $0x720] sm:$0xff]  ;;  %v1289_v15 = vld [vmem:[%s3170_s4 + $0x618] sm:$0xff] }
 0x540   :  { %1608 = vmatpush.msrb.mxu0 %v1256_v57  ;;  %1628 = vmatpush.msrb.mxu2 %v1272_v24  ;;  %v1338_v2 = vld [vmem:[%s3170_s4 + $0x7a0] sm:$0xff]  ;;  %v1305_v27 = vld [vmem:[%s3170_s4 + $0x698] sm:$0xff] }
 0x541   :  { %1569 = vmatpush.msrb.mxu1 %v1223_v25  ;;  %1589 = vmatpush.msrb.mxu3 %v1239_v21  ;;  %v1321_v57 = vld [vmem:[%s3170_s4 + $0x718] sm:$0xff]  ;;  %v1288_v25 = vld [vmem:[%s3170_s4 + $0x610] sm:$0xff] }
 0x542   :  { %1609 = vmatpush.msrb.mxu0 %v1255_v30  ;;  %1629 = vmatpush.msrb.mxu2 %v1271_v1  ;;  %v1337_v24 = vld [vmem:[%s3170_s4 + $0x798] sm:$0xff]  ;;  %v1304_v21 = vld [vmem:[%s3170_s4 + $0x690] sm:$0xff] }
 0x543   :  { %1570 = vmatpush.msrb.mxu1 %v1222_v34  ;;  %1590 = vmatpush.msrb.mxu3 %v1238_v23  ;;  %v1320_v30 = vld [vmem:[%s3170_s4 + $0x710] sm:$0xff]  ;;  %v1287_v34 = vld [vmem:[%s3170_s4 + $0x608] sm:$0xff] }
 0x544   :  { %1610 = vmatpush.msrb.mxu0 %v1254_v3  ;;  %1630 = vmatpush.msrb.mxu2 %v1270_v42  ;;  %v1336_v1 = vld [vmem:[%s3170_s4 + $0x790] sm:$0xff]  ;;  %v1303_v23 = vld [vmem:[%s3170_s4 + $0x688] sm:$0xff] }
 0x545   :  { %1571 = vmatmul.f32.vlgmr.msrb.gmra.mxu1 %v1371_v14  ;;  %1591 = vmatmul.f32.vlgmr.msrb.gmra.mxu3 %v1372_v17  ;;  %v1319_v3 = vld [vmem:[%s3170_s4 + $0x708] sm:$0xff]  ;;  %v1375_v14 = vld.sshfl [vmem:[#allocation1 + $0x20] sm:$0xff pattern:$0x73625140] }
 0x546   :  { %1611 = vmatmul.f32.vlgmr.msrb.gmra.mxu0 %v1373_v31  ;;  %1631 = vmatmul.f32.vlgmr.msrb.gmra.mxu2 %v1374_v52  ;;  %v1335_v42 = vld [vmem:[%s3170_s4 + $0x788] sm:$0xff]  ;;  %v1377_v31 = vld.sshfl [vmem:[#allocation1 + $0x30] sm:$0xff pattern:$0x73625140] }
 0x547   :  { %1635 = vmatpush.msra.mxu1 %v1301_v28  ;;  %1655 = vmatpush.msra.mxu3 %v1317_v53  ;;  %v1286_v28 = vld [vmem:[%s3170_s4 + $0x600] sm:$0xff]  ;;  %v1376_v17 = vld.sshfl [vmem:[#allocation1 + $0x28] sm:$0xff pattern:$0x73625140] }
 0x548   :  { %1675 = vmatpush.msra.mxu0 %v1333_v43  ;;  %1695 = vmatpush.msra.mxu2 %v1349_v39  ;;  %v1302_v53 = vld [vmem:[%s3170_s4 + $0x680] sm:$0xff]  ;;  %v1378_v52 = vld.sshfl [vmem:[#allocation1 + $0x38] sm:$0xff pattern:$0x73625140] }
 0x549   :  { %1636 = vmatpush.msra.mxu1 %v1300_v62  ;;  %1656 = vmatpush.msra.mxu3 %v1316_v18  ;;  %v1318_v43 = vld [vmem:[%s3170_s4 + $0x700] sm:$0xff] }
 0x54a   :  { %1676 = vmatpush.msra.mxu0 %v1332_v40  ;;  %1696 = vmatpush.msra.mxu2 %v1348_v0  ;;  %v1334_v39 = vld [vmem:[%s3170_s4 + $0x780] sm:$0xff]  ;;  %s1887_s4 = smov [#allocation3]  }
 0x54b   :  { %1637 = vmatpush.msra.mxu1 %v1299_v61  ;;  %1657 = vmatpush.msra.mxu3 %v1315_v45  ;;  %v1792_v62 = vld [vmem:[%s3171_s5] ss:$0 sm:$0xff]  ;;  %s1722_s5 = sshll.u32 %s1887_s4, 4  ;;  %s1723_s5 = int_to_ptr.vmem [resolvable:$true] %s1722_s5 }
 0x54c   :  { %1677 = vmatpush.msra.mxu0 %v1331_v33  ;;  %1697 = vmatpush.msra.mxu2 %v1347_v46 }
 0x54d   :  { %1638 = vmatpush.msra.mxu1 %v1298_v22  ;;  %1658 = vmatpush.msra.mxu3 %v1314_v58 }
 0x54e   :  { %1678 = vmatpush.msra.mxu0 %v1330_v51  ;;  %1698 = vmatpush.msra.mxu2 %v1346_v36 }
 0x54f   :  { %1639 = vmatpush.msra.mxu1 %v1297_v54  ;;  %1659 = vmatpush.msra.mxu3 %v1313_v55 }
 0x550   :  { %1679 = vmatpush.msra.mxu0 %v1329_v48  ;;  %1699 = vmatpush.msra.mxu2 %v1345_v56 }
 0x551   :  { %1640 = vmatpush.msra.mxu1 %v1296_v26  ;;  %1660 = vmatpush.msra.mxu3 %v1312_v47 }
 0x552   :  { %1680 = vmatpush.msra.mxu0 %v1328_v60  ;;  %1700 = vmatpush.msra.mxu2 %v1344_v50 }
 0x553   :  { %1641 = vmatpush.msra.mxu1 %v1295_v63  ;;  %1661 = vmatpush.msra.mxu3 %v1311_v20 }
 0x554   :  { %1681 = vmatpush.msra.mxu0 %v1327_v12  ;;  %1701 = vmatpush.msra.mxu2 %v1343_v29 }
 0x555   :  { %1642 = vmatpush.msra.mxu1 %v1294_v7  ;;  %1662 = vmatpush.msra.mxu3 %v1310_v35 }
 0x556   :  { %1682 = vmatpush.msra.mxu0 %v1326_v4  ;;  %1702 = vmatpush.msra.mxu2 %v1342_v59 }
 0x557   :  { %1643 = vmatpush.msra.mxu1 %v1293_v5  ;;  %1663 = vmatpush.msra.mxu3 %v1309_v6 }
 0x558   :  { %1683 = vmatpush.msra.mxu0 %v1325_v16  ;;  %1703 = vmatpush.msra.mxu2 %v1341_v44 }
 0x559   :  { %1644 = vmatpush.msra.mxu1 %v1292_v8  ;;  %1664 = vmatpush.msra.mxu3 %v1308_v19 }
 0x55a   :  { %1684 = vmatpush.msra.mxu0 %v1324_v41  ;;  %1704 = vmatpush.msra.mxu2 %v1340_v9 }
 0x55b   :  { %1645 = vmatpush.msra.mxu1 %v1291_v10  ;;  %1665 = vmatpush.msra.mxu3 %v1307_v32 }
 0x55c   :  { %1685 = vmatpush.msra.mxu0 %v1323_v11  ;;  %1705 = vmatpush.msra.mxu2 %v1339_v37 }
 0x55d   :  { %1646 = vmatpush.msra.mxu1 %v1290_v38  ;;  %1666 = vmatpush.msra.mxu3 %v1306_v49 }
 0x55e   :  { %1686 = vmatpush.msra.mxu0 %v1322_v13  ;;  %1706 = vmatpush.msra.mxu2 %v1338_v2 }
 0x55f   :  { %1647 = vmatpush.msra.mxu1 %v1289_v15  ;;  %1667 = vmatpush.msra.mxu3 %v1305_v27 }
 0x560   :  { %1687 = vmatpush.msra.mxu0 %v1321_v57  ;;  %1707 = vmatpush.msra.mxu2 %v1337_v24 }
 0x561   :  { %1648 = vmatpush.msra.mxu1 %v1288_v25  ;;  %1668 = vmatpush.msra.mxu3 %v1304_v21 }
 0x562   :  { %1688 = vmatpush.msra.mxu0 %v1320_v30  ;;  %1708 = vmatpush.msra.mxu2 %v1336_v1 }
 0x563   :  { %1649 = vmatpush.msra.mxu1 %v1287_v34  ;;  %1669 = vmatpush.msra.mxu3 %v1303_v23 }
 0x564   :  { %1689 = vmatpush.msra.mxu0 %v1319_v3  ;;  %1709 = vmatpush.msra.mxu2 %v1335_v42 }
 0x565   :  { %1650 = vmatpush.msra.mxu1 %v1286_v28  ;;  %1670 = vmatpush.msra.mxu3 %v1302_v53 }
 0x566   :  { %1690 = vmatpush.msra.mxu0 %v1318_v43  ;;  %1710 = vmatpush.msra.mxu2 %v1334_v39 }
 0x567   :  { %1651 = vmatmul.f32.vlgmr.msra.gmra.mxu1 %v1375_v14  ;;  %1671 = vmatmul.f32.vlgmr.msra.gmra.mxu3 %v1376_v17 }
 0x568   :  { %1691 = vmatmul.f32.vlgmr.msra.gmra.mxu0 %v1377_v31  ;;  %1711 = vmatmul.f32.vlgmr.msra.gmra.mxu2 %v1378_v52 }
 0x59e   :  { %v1412_v18 = vpop.f32.mrf.mxu1 }
 0x59f   :  { %v1413_v0 = vadd.f32 %v1792_v62, %v1412_v18  ;;  %v1452_v45 = vpop.f32.mrf.mxu0 }
 0x5a4   :  { %v1432_v40 = vpop.f32.mrf.mxu3 }
 0x5a5   :  { %v1433_v61 = vadd.f32 %v1432_v40, %v1413_v0  ;;  %v1472_v46 = vpop.f32.mrf.mxu2 }
 0x5a7   :  { %v1453_v33 = vadd.f32 %v1452_v45, %v1433_v61 }
 0x5a8   :  { %v1492_v58 = vpop.f32.mrf.mxu1 }
 0x5a9   :  { %v1473_v22 = vadd.f32 %v1472_v46, %v1453_v33  ;;  %v1532_v55 = vpop.f32.mrf.mxu0 }
 0x5ab   :  { %v1493_v51 = vadd.f32 %v1492_v58, %v1473_v22 }
 0x5ae   :  { %v1512_v36 = vpop.f32.mrf.mxu3 }
 0x5af   :  { %v1513_v54 = vadd.f32 %v1512_v36, %v1493_v51  ;;  %v1552_v56 = vpop.f32.mrf.mxu2 }
 0x5b1   :  { %v1533_v48 = vadd.f32 %v1532_v55, %v1513_v54 }
 0x5b3   :  { %v1553_v47 = vadd.f32 %v1552_v56, %v1533_v48 }
 0x5c2   :  { %v1572_v26 = vpop.f32.mrf.mxu1 }
 0x5c3   :  { %v1573_v50 = vadd.f32 %v1572_v26, %v1553_v47  ;;  %v1612_v20 = vpop.f32.mrf.mxu0 }
 0x5c8   :  { %v1592_v60 = vpop.f32.mrf.mxu3 }
 0x5c9   :  { %v1593_v63 = vadd.f32 %v1592_v60, %v1573_v50  ;;  %v1632_v29 = vpop.f32.mrf.mxu2 }
 0x5cb   :  { %v1613_v12 = vadd.f32 %v1612_v20, %v1593_v63 }
 0x5cd   :  { %v1633_v35 = vadd.f32 %v1632_v29, %v1613_v12 }
 0x5e4   :  { %v1652_v7 = vpop.f32.mrf.mxu1 }
 0x5e5   :  { %v1653_v4 = vadd.f32 %v1652_v7, %v1633_v35  ;;  %v1692_v6 = vpop.f32.mrf.mxu0 }
 0x5ea   :  { %v1672_v59 = vpop.f32.mrf.mxu3 }
 0x5eb   :  { %v1673_v5 = vadd.f32 %v1672_v59, %v1653_v4  ;;  %v1712_v44 = vpop.f32.mrf.mxu2 }
 0x5ed   :  { %v1693_v16 = vadd.f32 %v1692_v6, %v1673_v5 }
 0x5ef   :  { %v1713_v8 = vadd.f32 %v1712_v44, %v1693_v16 }
 0x5f1   :  { %1716 = vst.msk [vmem:[#allocation3] sm:$0x3] %vm1715_vm1, %v1713_v8 }
 0x5f2   :  { %1727 = dma.vmem_to_hbm [thread:$0]  %s1723_s5, 32, %s1725_s10, [#allocation4]  }
 0x5f3   :  { %1881 = dma.done.wait [#allocation4], 32  }
 0x5f4   :  { %1882 = vsyncadd [#allocation4], 4294967264 }
 0x5f5   :  { %1732 = vsyncpa [#allocation4], 1 }

</bundles_post_ra>
